<compile_context>
chip_gen: v7x
topology: tpu7x:2x2x1
jax: 0.10.0
libtpu: 0.0.40
codegen_flags: <defaults>
</compile_context>

<pallas_src>
import numpy as np
import jax
import jax.numpy as jnp
from jax.experimental import pallas as pl
from jax.experimental.pallas import tpu as pltpu

POOL = 4
WIN = POOL ** 3  # 64 positions per 4x4x4 pooling window


# ----------------------------------------------------------------------------- #
# Pallas kernel: fused channel-softmax -> maxpool/unpool mask -> feature gating
# ----------------------------------------------------------------------------- #
def _control_point_kernel(x1_ref, x2_ref, o1_ref, o2_ref):
    """Blocks: x*_ref / o*_ref are (C, 64, TN) window-major tiles."""

    def branch(x):
        # softmax over channels (leading axis)
        m = jnp.max(x, axis=0, keepdims=True)
        e = jnp.exp(x - m)
        s = e / jnp.sum(e, axis=0, keepdims=True)
        # MaxPool3d(4,4)+MaxUnpool3d(4,4): keep s only where it is the max of its
        # 4x4x4 window (axis=1 holds the 64 in-window positions), zero elsewhere.
        # Ties keep all max positions (PyTorch keeps one index); identical for
        # generic continuous inputs.
        wmax = jnp.max(s, axis=1, keepdims=True)
        # unpooled softmax gate * raw features (control_p * feats_cat)
        return jnp.where(s == wmax, s * x, jnp.zeros_like(s))

    o1_ref[...] = branch(x1_ref[...]).astype(o1_ref.dtype)
    o2_ref[...] = branch(x2_ref[...]).astype(o2_ref.dtype)


# ----------------------------------------------------------------------------- #
# Layout helpers (plain JAX / XLA)
# ----------------------------------------------------------------------------- #
def _to_window_major(x):
    b, c, w, h, d = x.shape
    x = x.reshape(b, c, w // POOL, POOL, h // POOL, POOL, d // POOL, POOL)
    x = x.transpose(0, 1, 3, 5, 7, 2, 4, 6)  # (b, c, w4, h4, d4, wq, hq, dq)
    return x.reshape(b, c, WIN, (w // POOL) * (h // POOL) * (d // POOL))


def _from_window_major(x, spatial):
    b, c = x.shape[:2]
    w, h, d = spatial
    x = x.reshape(b, c, POOL, POOL, POOL, w // POOL, h // POOL, d // POOL)
    x = x.transpose(0, 1, 5, 2, 6, 3, 7, 4)  # (b, c, wq, w4, hq, h4, dq, d4)
    return x.reshape(b, c, w, h, d)


def _adaptive_avg_pool3d(x, out_size):
    """nn.AdaptiveAvgPool3d semantics via per-axis averaging matrices (plain JAX)."""
    # TODO(synk): adaptive average pooling stays outside Pallas (shape-dependent
    # constant-weight contraction); XLA handles it as three small einsums.
    def pool_matrix(n_in, n_out):
        p = np.zeros((n_out, n_in), np.float32)
        for o in range(n_out):
            lo = (o * n_in) // n_out
            hi = -(-((o + 1) * n_in) // n_out)  # ceil
            p[o, lo:hi] = 1.0 / (hi - lo)
        return jnp.asarray(p)

    pw = pool_matrix(x.shape[2], out_size[0])
    ph = pool_matrix(x.shape[3], out_size[1])
    pd = pool_matrix(x.shape[4], out_size[2])
    return jnp.einsum("bcxyz,wx,hy,dz->bcwhd", x, pw, ph, pd)


def _reference_grid3d(batch, spatial, dtype=jnp.float32):
    # TODO(synk): get_reference_grid3d is not defined in the provided spec; assume
    # the usual normalized meshgrid convention torch.linspace(-1, 1, n) per axis.
    axes = [jnp.linspace(-1.0, 1.0, n, dtype=dtype) for n in spatial]
    grid = jnp.stack(jnp.meshgrid(*axes, indexing="ij"), axis=0)  # (3, W, H, D)
    return jnp.broadcast_to(grid[None], (batch, 3) + tuple(spatial))


# ----------------------------------------------------------------------------- #
# Module forward
# ----------------------------------------------------------------------------- #
def control_point_net_cat(inp, inp2, img, *, tn=None,
                          vmem_block_budget=8 * 1024 * 1024):
    assert inp.shape == inp2.shape, "inp and inp2 must have identical shapes"
    b, c, w, h, d = inp.shape
    assert w % POOL == 0 and h % POOL == 0 and d % POOL == 0, \
        "spatial dims must be multiples of the pool size (4)"
    assert img.shape[0] == b and img.shape[1] == 2, \
        "module's final (B, 2C+2, N) view assumes img has 2 channels"

    n_win = (w // POOL) * (h // POOL) * (d // POOL)
    itemsize = jnp.dtype(inp.dtype).itemsize

    x1 = _to_window_major(inp)
    x2 = _to_window_major(inp2)

    # Biggest nW tile that fits the VMEM budget (full extent for typical sizes).
    if tn is None:
        if c * WIN * n_win * itemsize <= vmem_block_budget:
            tn = n_win
        else:
            tn = max(128, (vmem_block_budget // (c * WIN * itemsize)) // 128 * 128)
    n_pad = pl.cdiv(n_win, tn) * tn
    if n_pad != n_win:
        pad = [(0, 0), (0, 0), (0, 0), (0, n_pad - n_win)]
        x1 = jnp.pad(x1, pad)
        x2 = jnp.pad(x2, pad)

    blk = pl.BlockSpec((None, c, WIN, tn), lambda bi, ni: (bi, 0, 0, ni))
    out_sds = jax.ShapeDtypeStruct((b, c, WIN, n_pad), inp.dtype)

    y1, y2 = pl.pallas_call(
        _control_point_kernel,
        out_shape=(out_sds, out_sds),
        grid_spec=pltpu.PrefetchScalarGridSpec(
            num_scalar_prefetch=0,
            grid=(b, n_pad // tn),
            in_specs=[blk, blk],
            out_specs=(blk, blk),
        ),
        compiler_params=pltpu.CompilerParams(
            dimension_semantics=("parallel", "parallel"),
        ),
        cost_estimate=pl.CostEstimate(
            flops=16 * b * c * w * h * d,
            transcendentals=2 * b * c * w * h * d,
            bytes_accessed=4 * b * c * w * h * d * itemsize,
        ),
    )(x1, x2)

    if n_pad != n_win:
        y1 = y1[..., :n_win]
        y2 = y2[..., :n_win]

    cp = jnp.concatenate([y1, y2], axis=1)            # (B, 2C, 64, nW)
    cp = _from_window_major(cp, (w, h, d))            # (B, 2C, W, H, D)

    img_pooled = _adaptive_avg_pool3d(img.astype(inp.dtype), (w, h, d))
    control_p = jnp.concatenate([cp, img_pooled], axis=1).reshape(b, 2 * c + 2,
                                                                  w * h * d)
    grid = _reference_grid3d(b, (w, h, d), inp.dtype).reshape(b, 3, w * h * d)
    return control_p, grid


# ----------------------------------------------------------------------------- #
# Pure-JAX reference of the PyTorch forward (independent code path)
# ----------------------------------------------------------------------------- #
def _reference_forward(inp, inp2, img):
    b, c, w, h, d = inp.shape

    def branch(x):
        s = jax.nn.softmax(x, axis=1)
        sw = s.reshape(b, c, w // POOL, POOL, h // POOL, POOL, d // POOL, POOL)
        m = jnp.max(sw, axis=(3, 5, 7), keepdims=True)
        u = jnp.where(sw == m, sw, 0.0).reshape(b, c, w, h, d)
        return u * x  # unpool(maxpool(softmax(x))) * raw features

    cp = jnp.concatenate([branch(inp), branch(inp2)], axis=1)
    imgp = _adaptive_avg_pool3d(img, (w, h, d))
    control_p = jnp.concatenate([cp, imgp], axis=1).reshape(b, 2 * c + 2, -1)
    grid = _reference_grid3d(b, (w, h, d)).reshape(b, 3, -1)
    return control_p, grid


if __name__ == "__main__":
    key = jax.random.PRNGKey(0)
    k1, k2, k3 = jax.random.split(key, 3)

    B, C = 2, 4
    W = H = D = 8                      # small, divisible by the 4x4x4 pool window
    inp = jax.random.normal(k1, (B, C, W, H, D), dtype=jnp.float32)
    inp2 = jax.random.normal(k2, (B, C, W, H, D), dtype=jnp.float32)
    img = jax.random.normal(k3, (B, 2, 16, 16, 16), dtype=jnp.float32)

    control_p, grid = control_point_net_cat(inp, inp2, img)
    control_p, grid = jax.block_until_ready((control_p, grid))

    ref_cp, ref_grid = _reference_forward(inp, inp2, img)
    assert control_p.shape == (B, 2 * C + 2, W * H * D)
    assert grid.shape == (B, 3, W * H * D)
    assert jnp.allclose(control_p, ref_cp, atol=1e-5, rtol=1e-5)
    assert jnp.allclose(grid, ref_grid, atol=1e-6, rtol=1e-6)

    print("KERNEL_OK")
</pallas_src>

<mosaic_0001>
module attributes {stable_mosaic.version = 11 : i64} {
  func.func @_control_point_kernel(%arg0: i32, %arg1: i32, %arg2: memref<1x4x64x8xf32, #tpu.memory_space<vmem>>, %arg3: memref<1x4x64x8xf32, #tpu.memory_space<vmem>>, %arg4: memref<1x4x64x8xf32, #tpu.memory_space<vmem>>, %arg5: memref<1x4x64x8xf32, #tpu.memory_space<vmem>>) attributes {dimension_semantics = [#tpu.dimension_semantics<parallel>, #tpu.dimension_semantics<parallel>], iteration_bounds = array<i64: 2, 1>, scalar_prefetch = 0 : i64, scratch_operands = 0 : i64, tpu.core_type = #tpu.core_type<tc>, window_params = [{transform_indices = @transform_0, window_bounds = array<i64: 1, 4, 64, 8>}, {transform_indices = @transform_1, window_bounds = array<i64: 1, 4, 64, 8>}, {transform_indices = @transform_2, window_bounds = array<i64: 1, 4, 64, 8>}, {transform_indices = @transform_3, window_bounds = array<i64: 1, 4, 64, 8>}]} {
    %c0 = arith.constant 0 : index
    %c0_0 = arith.constant 0 : index
    %c0_1 = arith.constant 0 : index
    %c0_2 = arith.constant 0 : index
    %0 = vector.load %arg2[%c0, %c0_0, %c0_1, %c0_2] : memref<1x4x64x8xf32, #tpu.memory_space<vmem>>, vector<1x4x64x8xf32>
    %1 = vector.shape_cast %0 : vector<1x4x64x8xf32> to vector<4x64x8xf32>
    %cst = arith.constant dense<0xFF800000> : vector<64x8xf32>
    %2 = vector.multi_reduction <maximumf>, %1, %cst [0] : vector<4x64x8xf32> to vector<64x8xf32>
    %3 = vector.shape_cast %2 : vector<64x8xf32> to vector<1x64x8xf32>
    %4 = vector.broadcast %3 : vector<1x64x8xf32> to vector<4x64x8xf32>
    %5 = arith.subf %1, %4 : vector<4x64x8xf32>
    %6 = math.exp %5 : vector<4x64x8xf32>
    %cst_3 = arith.constant dense<0.000000e+00> : vector<64x8xf32>
    %7 = vector.multi_reduction <add>, %6, %cst_3 [0] : vector<4x64x8xf32> to vector<64x8xf32>
    %8 = vector.shape_cast %7 : vector<64x8xf32> to vector<1x64x8xf32>
    %9 = vector.broadcast %8 : vector<1x64x8xf32> to vector<4x64x8xf32>
    %10 = arith.divf %6, %9 : vector<4x64x8xf32>
    %cst_4 = arith.constant dense<0xFF800000> : vector<4x8xf32>
    %11 = vector.multi_reduction <maximumf>, %10, %cst_4 [1] : vector<4x64x8xf32> to vector<4x8xf32>
    %12 = vector.shape_cast %11 : vector<4x8xf32> to vector<4x1x8xf32>
    %13 = vector.broadcast %12 : vector<4x1x8xf32> to vector<4x64x8xf32>
    %14 = arith.cmpf oeq, %10, %13 : vector<4x64x8xf32>
    %15 = arith.mulf %10, %1 : vector<4x64x8xf32>
    %cst_5 = arith.constant 0.000000e+00 : f32
    %16 = vector.broadcast %cst_5 : f32 to vector<4x64x8xf32>
    %17 = arith.select %14, %15, %16 : vector<4x64x8xi1>, vector<4x64x8xf32>
    %c0_6 = arith.constant 0 : index
    %c0_7 = arith.constant 0 : index
    %c0_8 = arith.constant 0 : index
    %c0_9 = arith.constant 0 : index
    %18 = vector.load %arg4[%c0_6, %c0_7, %c0_8, %c0_9] : memref<1x4x64x8xf32, #tpu.memory_space<vmem>>, vector<1x4x64x8xf32>
    %19 = vector.shape_cast %18 : vector<1x4x64x8xf32> to vector<4x64x8xf32>
    %20 = vector.shape_cast %17 : vector<4x64x8xf32> to vector<1x4x64x8xf32>
    tpu.vector_store %arg4[%c0_6, %c0_7, %c0_8, %c0_9], %20 {strides = array<i32>} : memref<1x4x64x8xf32, #tpu.memory_space<vmem>>, vector<1x4x64x8xf32>,
    %c0_10 = arith.constant 0 : index
    %c0_11 = arith.constant 0 : index
    %c0_12 = arith.constant 0 : index
    %c0_13 = arith.constant 0 : index
    %21 = vector.load %arg3[%c0_10, %c0_11, %c0_12, %c0_13] : memref<1x4x64x8xf32, #tpu.memory_space<vmem>>, vector<1x4x64x8xf32>
    %22 = vector.shape_cast %21 : vector<1x4x64x8xf32> to vector<4x64x8xf32>
    %cst_14 = arith.constant dense<0xFF800000> : vector<64x8xf32>
    %23 = vector.multi_reduction <maximumf>, %22, %cst_14 [0] : vector<4x64x8xf32> to vector<64x8xf32>
    %24 = vector.shape_cast %23 : vector<64x8xf32> to vector<1x64x8xf32>
    %25 = vector.broadcast %24 : vector<1x64x8xf32> to vector<4x64x8xf32>
    %26 = arith.subf %22, %25 : vector<4x64x8xf32>
    %27 = math.exp %26 : vector<4x64x8xf32>
    %cst_15 = arith.constant dense<0.000000e+00> : vector<64x8xf32>
    %28 = vector.multi_reduction <add>, %27, %cst_15 [0] : vector<4x64x8xf32> to vector<64x8xf32>
    %29 = vector.shape_cast %28 : vector<64x8xf32> to vector<1x64x8xf32>
    %30 = vector.broadcast %29 : vector<1x64x8xf32> to vector<4x64x8xf32>
    %31 = arith.divf %27, %30 : vector<4x64x8xf32>
    %cst_16 = arith.constant dense<0xFF800000> : vector<4x8xf32>
    %32 = vector.multi_reduction <maximumf>, %31, %cst_16 [1] : vector<4x64x8xf32> to vector<4x8xf32>
    %33 = vector.shape_cast %32 : vector<4x8xf32> to vector<4x1x8xf32>
    %34 = vector.broadcast %33 : vector<4x1x8xf32> to vector<4x64x8xf32>
    %35 = arith.cmpf oeq, %31, %34 : vector<4x64x8xf32>
    %36 = arith.mulf %31, %22 : vector<4x64x8xf32>
    %cst_17 = arith.constant 0.000000e+00 : f32
    %37 = vector.broadcast %cst_17 : f32 to vector<4x64x8xf32>
    %38 = arith.select %35, %36, %37 : vector<4x64x8xi1>, vector<4x64x8xf32>
    %c0_18 = arith.constant 0 : index
    %c0_19 = arith.constant 0 : index
    %c0_20 = arith.constant 0 : index
    %c0_21 = arith.constant 0 : index
    %39 = vector.load %arg5[%c0_18, %c0_19, %c0_20, %c0_21] : memref<1x4x64x8xf32, #tpu.memory_space<vmem>>, vector<1x4x64x8xf32>
    %40 = vector.shape_cast %39 : vector<1x4x64x8xf32> to vector<4x64x8xf32>
    %41 = vector.shape_cast %38 : vector<4x64x8xf32> to vector<1x4x64x8xf32>
    tpu.vector_store %arg5[%c0_18, %c0_19, %c0_20, %c0_21], %41 {strides = array<i32>} : memref<1x4x64x8xf32, #tpu.memory_space<vmem>>, vector<1x4x64x8xf32>,
    return
  }
  func.func @transform_0(%arg0: i32, %arg1: i32) -> (i32, i32, i32, i32) {
    %c0_i32 = arith.constant 0 : i32
    %c0_i32_0 = arith.constant 0 : i32
    %c0_i32_1 = arith.constant 0 : i32
    return %arg0, %c0_i32, %c0_i32_0, %arg1 : i32, i32, i32, i32
  }
  func.func @transform_1(%arg0: i32, %arg1: i32) -> (i32, i32, i32, i32) {
    %c0_i32 = arith.constant 0 : i32
    %c0_i32_0 = arith.constant 0 : i32
    %c0_i32_1 = arith.constant 0 : i32
    return %arg0, %c0_i32, %c0_i32_0, %arg1 : i32, i32, i32, i32
  }
  func.func @transform_2(%arg0: i32, %arg1: i32) -> (i32, i32, i32, i32) {
    %c0_i32 = arith.constant 0 : i32
    %c0_i32_0 = arith.constant 0 : i32
    %c0_i32_1 = arith.constant 0 : i32
    return %arg0, %c0_i32, %c0_i32_0, %arg1 : i32, i32, i32, i32
  }
  func.func @transform_3(%arg0: i32, %arg1: i32) -> (i32, i32, i32, i32) {
    %c0_i32 = arith.constant 0 : i32
    %c0_i32_0 = arith.constant 0 : i32
    %c0_i32_1 = arith.constant 0 : i32
    return %arg0, %c0_i32, %c0_i32_0, %arg1 : i32, i32, i32, i32
  }
}

</mosaic_0001>

<bundles_post_ra>
// kernel: tpu_custom_call.1
= control target key start
LH: loop header
LB: loop body
LE: loop exit
PB: predicated region body
PF: predicated region fallthrough
CT: control target
= control target key end

     0   :  { %s1682_s12 = smov 0   ;;  %s1684_s13 = smov 0   ;;  %s3300_s0 = inlined_call_operand.vmem [shape: f32[2,4,64,8], index: 0, kind: input, shape index: {}]   ;;  %s3301_s1 = inlined_call_operand.vmem [shape: f32[2,4,64,8], index: 1, kind: input, shape index: {}]   ;;  %s3302_s2 = inlined_call_operand.vmem [shape: f32[2,4,64,8], index: 2, kind: output, shape index: {0}]   ;;  %s3303_s3 = inlined_call_operand.vmem [shape: f32[2,4,64,8], index: 3, kind: output, shape index: {1}]  }
   0x1   :  { %s1686_s14 = smov 0  }
   0x2 LB: > { %s26_s15 = sadd.s32 1, %s1656_s13  ;;  %p1391_p0 = scmp.ge.s32.totalorder %s1660_s14, 1  ;;  %s1660_s14 = sphi %s1686_s14, %s14_s14   ;;  %s1656_s13 = sphi %s1684_s13, %s3501_s13   ;;  %s1652_s12 = sphi %s1682_s12, %s3500_s12  }
   0x3   : > { %p28_p1 = scmp.ge.s32.totalorder %s26_s15, 2  ;;  %p176_p2 = scmp.lt.s32.totalorder %s1660_s14, 3 }
   0x5   : > { %s3503_s15 = smov (%p28_p1, %s26_s15), 0  ;;  %p177_p3 = pnand %p1391_p0, %p176_p2 }
   0x7   : > { %180 = sbr.rel (%p177_p3) target bundleno = 264 (0x108), region = 28 }
   0xe   : > { %p222_p4 = scmp.lt.s32.totalorder %s1652_s12, 1  ;;  %vm286_vm0 = vcmask 64512  }
  0x10   : > { %s3505_s12 = smov (!%p222_p4, %s1652_s12), 1 }
  0x11   : > { %s1700_s16 = sshll.u32 %s3505_s12, 8 }
  0x12   : > { %s1706_s19 = scalar_lea.vmem %s3300_s0, %s1700_s16  ;;  %s1932_s22 = scalar_lea.vmem %s3301_s1, %s1700_s16 }
  0x13   : > { %v1709_v0 = vld [vmem:[%s1706_s19] sm:$0xff]  ;;  %v1712_v1 = vld [vmem:[%s1706_s19 + $0x8] sm:$0xff]  ;;  %v1715_v2 = vld [vmem:[%s1706_s19 + $0x10] sm:$0xff]  ;;  %s2526_s25 = scalar_lea.vmem %s3302_s2, %s1700_s16  ;;  %s3127_s28 = scalar_lea.vmem %s3303_s3, %s1700_s16 }
  0x14   : > { %3374 = vst [vmem:[#allocation2_spill] sm:$0xff] %v1709_v0  ;;  %3375 = vst [vmem:[#allocation3_spill] sm:$0xff] %v1712_v1  ;;  %v1718_v3 = vld [vmem:[%s1706_s19 + $0x18] sm:$0xff]  ;;  %v1721_v4 = vld [vmem:[%s1706_s19 + $0x20] sm:$0xff]  ;;  %v287_v7 = vsel %vm286_vm0, %v1709_v0, -inf  ;;  %v294_v8 = vsel %vm286_vm0, %v1712_v1, -inf }
  0x15   : > { %3376 = vst [vmem:[#allocation4_spill] sm:$0xff] %v1715_v2  ;;  %3377 = vst [vmem:[#allocation5_spill] sm:$0xff] %v1718_v3  ;;  %v1724_v5 = vld [vmem:[%s1706_s19 + $0x28] sm:$0xff]  ;;  %v1727_v6 = vld [vmem:[%s1706_s19 + $0x40] sm:$0xff]  ;;  %v301_v13 = vsel %vm286_vm0, %v1715_v2, -inf  ;;  %v308_v14 = vsel %vm286_vm0, %v1718_v3, -inf }
  0x16   : > { %3378 = vst [vmem:[#allocation6_spill] sm:$0xff] %v1721_v4  ;;  %3379 = vst [vmem:[#allocation7_spill] sm:$0xff] %v1724_v5  ;;  %v1734_v9 = vld [vmem:[%s1706_s19 + $0x48] sm:$0xff]  ;;  %v1737_v10 = vld [vmem:[%s1706_s19 + $0x50] sm:$0xff]  ;;  %v288_v12 = vsel %vm286_vm0, %v1727_v6, -inf  ;;  %v315_v24 = vsel %vm286_vm0, %v1721_v4, -inf }
  0x17   : > { %3380 = vst [vmem:[#allocation8_spill] sm:$0xff] %v1727_v6  ;;  %3381 = vst [vmem:[#allocation9_spill] sm:$0xff] %v1734_v9  ;;  %v1740_v11 = vld [vmem:[%s1706_s19 + $0x58] sm:$0xff]  ;;  %v1749_v15 = vld [vmem:[%s1706_s19 + $0x30] sm:$0xff]  ;;  %v295_v18 = vsel %vm286_vm0, %v1734_v9, -inf  ;;  %v302_v19 = vsel %vm286_vm0, %v1737_v10, -inf  ;;  %v289_v30 = vmax.f32 %v287_v7, %v288_v12 }
  0x18   : > { %3382 = vst [vmem:[#allocation10_spill] sm:$0xff] %v1737_v10  ;;  %3383 = vst [vmem:[#allocation11_spill] sm:$0xff] %v1740_v11  ;;  %v1752_v16 = vld [vmem:[%s1706_s19 + $0x60] sm:$0xff]  ;;  %v1755_v17 = vld [vmem:[%s1706_s19 + $0x68] sm:$0xff]  ;;  %v309_v20 = vsel %vm286_vm0, %v1740_v11, -inf  ;;  %v322_v26 = vsel %vm286_vm0, %v1724_v5, -inf  ;;  %v296_v31 = vmax.f32 %v294_v8, %v295_v18  ;;  %v303_v32 = vmax.f32 %v301_v13, %v302_v19 }
  0x19   : > { %3384 = vst [vmem:[#allocation12_spill] sm:$0xff] %v1749_v15  ;;  %3385 = vst [vmem:[#allocation13_spill] sm:$0xff] %v1752_v16  ;;  %v1764_v21 = vld [vmem:[%s1706_s19 + $0x38] sm:$0xff]  ;;  %v1767_v22 = vld [vmem:[%s1706_s19 + $0x80] sm:$0xff]  ;;  %v316_v25 = vsel %vm286_vm0, %v1752_v16, -inf  ;;  %v310_v33 = vmax.f32 %v308_v14, %v309_v20  ;;  %v323_v37 = vsel %vm286_vm0, %v1755_v17, -inf }
  0x1a   : > { %3386 = vst [vmem:[#allocation14_spill] sm:$0xff] %v1755_v17  ;;  %3387 = vst [vmem:[#allocation15_spill] sm:$0xff] %v1764_v21  ;;  %v1770_v23 = vld [vmem:[%s1706_s19 + $0x88] sm:$0xff]  ;;  %v1779_v27 = vld [vmem:[%s1706_s19 + $0x90] sm:$0xff]  ;;  %v290_v34 = vsel %vm286_vm0, %v1767_v22, -inf  ;;  %v317_v42 = vmax.f32 %v315_v24, %v316_v25  ;;  %v329_v47 = vsel %vm286_vm0, %v1749_v15, -inf  ;;  %v324_v55 = vmax.f32 %v322_v26, %v323_v37 }
  0x1b   : > { %v1782_v28 = vld [vmem:[%s1706_s19 + $0x98] sm:$0xff]  ;;  %v1785_v29 = vld [vmem:[%s1706_s19 + $0xa0] sm:$0xff]  ;;  %v297_v35 = vsel %vm286_vm0, %v1770_v23, -inf  ;;  %v304_v36 = vsel %vm286_vm0, %v1779_v27, -inf  ;;  %v1796_v38 = vld [vmem:[%s1706_s19 + $0xa8] sm:$0xff]  ;;  %v336_v48 = vsel %vm286_vm0, %v1764_v21, -inf  ;;  %v291_v52 = vmax.f32 %v289_v30, %v290_v34 }
  0x1c   : > { %v1799_v39 = vld [vmem:[%s1706_s19 + $0xc0] sm:$0xff]  ;;  %v1802_v40 = vld [vmem:[%s1706_s19 + $0xc8] sm:$0xff]  ;;  %v311_v41 = vsel %vm286_vm0, %v1782_v28, -inf  ;;  %v1807_v43 = vld [vmem:[%s1706_s19 + $0x70] sm:$0xff]  ;;  %v318_v46 = vsel %vm286_vm0, %v1785_v29, -inf  ;;  %v298_v53 = vmax.f32 %v296_v31, %v297_v35  ;;  %v305_v54 = vmax.f32 %v303_v32, %v304_v36 }
  0x1d   : > { %3388 = vst [vmem:[#allocation16_spill] sm:$0xff] %v1807_v43  ;;  %v1810_v44 = vld [vmem:[%s1706_s19 + $0xb0] sm:$0xff]  ;;  %v1822_v49 = vld [vmem:[%s1706_s19 + $0x78] sm:$0xff]  ;;  %v1831_v56 = vld [vmem:[%s1706_s19 + $0xe0] sm:$0xff]  ;;  %v292_v57 = vsel %vm286_vm0, %v1799_v39, -inf  ;;  %v299_v58 = vsel %vm286_vm0, %v1802_v40, -inf  ;;  %v312_v59 = vmax.f32 %v310_v33, %v311_v41  ;;  %v319_v63 = vmax.f32 %v317_v42, %v318_v46 }
  0x1e   : > { %v1813_v45 = vld [vmem:[%s1706_s19 + $0xd0] sm:$0xff]  ;;  %3389 = vst [vmem:[#allocation17_spill] sm:$0xff] %v1822_v49  ;;  %v1825_v50 = vld [vmem:[%s1706_s19 + $0xb8] sm:$0xff]  ;;  %v325_v60 = vsel %vm286_vm0, %v1796_v38, -inf  ;;  %v1840_v61 = vld [vmem:[%s1706_s19 + $0xe8] sm:$0xff]  ;;  %v330_v7 = vsel %vm286_vm0, %v1807_v43, -inf  ;;  %v1862_v30 = vmax.f32 %v291_v52, %v292_v57  ;;  %v1864_v31 = vmax.f32 %v298_v53, %v299_v58 }
  0x1f   : > { %v1828_v51 = vld [vmem:[%s1706_s19 + $0xd8] sm:$0xff]  ;;  %v306_v62 = vsel %vm286_vm0, %v1813_v45, -inf  ;;  %v332_v8 = vsel %vm286_vm0, %v1810_v44, -inf  ;;  %v1849_v12 = vld [vmem:[%s1706_s19 + $0xf0] sm:$0xff]  ;;  %v331_v14 = vmax.f32 %v329_v47, %v330_v7  ;;  %v337_v18 = vsel %vm286_vm0, %v1822_v49, -inf }
  0x20   : > { %v313_v13 = vsel %vm286_vm0, %v1828_v51, -inf  ;;  %v339_v19 = vsel %vm286_vm0, %v1825_v50, -inf  ;;  %v1858_v20 = vld [vmem:[%s1706_s19 + $0xf8] sm:$0xff]  ;;  %v320_v24 = vsel %vm286_vm0, %v1831_v56, -inf  ;;  %v326_v25 = vmax.f32 %v324_v55, %v325_v60 }
  0x21   : > { %v338_v26 = vmax.f32 %v336_v48, %v337_v18  ;;  %v327_v32 = vsel %vm286_vm0, %v1840_v61, -inf  ;;  %v333_v33 = vmax.f32 %v331_v14, %v332_v8  ;;  %v1868_v34 = vmax.f32 %v305_v54, %v306_v62 }
  0x22   : > { %v1870_v35 = vmax.f32 %v312_v59, %v313_v13  ;;  %v334_v36 = vsel %vm286_vm0, %v1849_v12, -inf  ;;  %v1874_v41 = vmax.f32 %v319_v63, %v320_v24  ;;  %v341_v42 = vsel %vm286_vm0, %v1858_v20, -inf }
  0x23   : > { %v340_v37 = vmax.f32 %v338_v26, %v339_v19  ;;  %v1878_v46 = vmax.f32 %v326_v25, %v327_v32  ;;  %v1880_v47 = vmax.f32 %v333_v33, %v334_v36  ;;  %v343_v48 = vsub.f32 %v1709_v0, %v1862_v30 }
  0x24   : > { %v344_v53 = vsub.f32 %v1712_v1, %v1864_v31  ;;  %v345_v54 = vsub.f32 %v1715_v2, %v1868_v34  ;;  %v346_v55 = vsub.f32 %v1718_v3, %v1870_v35  ;;  %v347_v57 = vsub.f32 %v1721_v4, %v1874_v41 }
  0x25   : > { %v1884_v52 = vmax.f32 %v340_v37, %v341_v42  ;;  %v348_v58 = vsub.f32 %v1724_v5, %v1878_v46  ;;  %v349_v59 = vsub.f32 %v1749_v15, %v1880_v47  ;;  %v375_v60 = vmul.f32 1.442695, %v343_v48 }
  0x26   : > { %v377_v63 = vmul.f32 1.442695, %v344_v53  ;;  %v379_v7 = vmul.f32 1.442695, %v345_v54  ;;  %v381_v8 = vmul.f32 1.442695, %v346_v55  ;;  %v351_v13 = vsub.f32 %v1727_v6, %v1862_v30 }
  0x27   : > { %v350_v62 = vsub.f32 %v1764_v21, %v1884_v52  ;;  %1430 = vpow2.f32 %v375_v60  ;;  %v383_v14 = vmul.f32 1.442695, %v347_v57  ;;  %v352_v18 = vsub.f32 %v1734_v9, %v1864_v31  ;;  %v2119_v21 = vld [vmem:[%s1932_s22 + $0x20] sm:$0xff] }
  0x28   : > { %1432 = vpow2.f32 %v377_v63  ;;  %v385_v19 = vmul.f32 1.442695, %v348_v58  ;;  %v353_v24 = vsub.f32 %v1737_v10, %v1868_v34  ;;  %v387_v25 = vmul.f32 1.442695, %v349_v59  ;;  %3403 = vst [vmem:[#allocation31_spill] sm:$0xff] %v2119_v21 }
  0x29   : > { %1434 = vpow2.f32 %v379_v7  ;;  %v354_v26 = vsub.f32 %v1740_v11, %v1870_v35  ;;  %v389_v32 = vmul.f32 1.442695, %v350_v62  ;;  %v355_v33 = vsub.f32 %v1752_v16, %v1874_v41 }
  0x2a   : > { %1436 = vpow2.f32 %v381_v8  ;;  %v391_v36 = vmul.f32 1.442695, %v351_v13  ;;  %v356_v37 = vsub.f32 %v1755_v17, %v1878_v46  ;;  %v393_v42 = vmul.f32 1.442695, %v352_v18 }
  0x2b   : > { %1438 = vpow2.f32 %v383_v14  ;;  %v357_v48 = vsub.f32 %v1807_v43, %v1880_v47  ;;  %v359_v53 = vsub.f32 %v1767_v22, %v1862_v30  ;;  %v395_v54 = vmul.f32 1.442695, %v353_v24  ;;  %v1953_v24 = vld [vmem:[%s1932_s22] sm:$0xff] }
  0x2c   : > { %1440 = vpow2.f32 %v385_v19  ;;  %v358_v55 = vsub.f32 %v1822_v49, %v1884_v52  ;;  %v360_v57 = vsub.f32 %v1770_v23, %v1864_v31  ;;  %v397_v58 = vmul.f32 1.442695, %v354_v26 }
  0x2d   : > { %1442 = vpow2.f32 %v387_v25  ;;  %v361_v59 = vsub.f32 %v1779_v27, %v1868_v34  ;;  %v362_v60 = vsub.f32 %v1782_v28, %v1870_v35  ;;  %v399_v62 = vmul.f32 1.442695, %v355_v33 }
  0x2e   : > { %1444 = vpow2.f32 %v389_v32  ;;  %v363_v22 = vsub.f32 %v1785_v29, %v1874_v41  ;;  %v364_v63 = vsub.f32 %v1796_v38, %v1878_v46  ;;  %v401_v7 = vmul.f32 1.442695, %v356_v37 }
  0x2f   : > { %1446 = vpow2.f32 %v391_v36  ;;  %v365_v27 = vsub.f32 %v1810_v44, %v1880_v47  ;;  %v366_v28 = vsub.f32 %v1825_v50, %v1884_v52  ;;  %v403_v29 = vmul.f32 1.442695, %v357_v48 }
  0x30   : > { %1448 = vpow2.f32 %v393_v42  ;;  %v367_v8 = vsub.f32 %v1799_v39, %v1862_v30  ;;  %v368_v13 = vsub.f32 %v1802_v40, %v1864_v31  ;;  %v405_v14 = vmul.f32 1.442695, %v358_v55  ;;  %v1956_v39 = vld [vmem:[%s1932_s22 + $0x40] sm:$0xff] }
  0x31   : > { %v1934_v23 = vpop.eup %1430  ;;  %1450 = vpow2.f32 %v395_v54  ;;  %v369_v44 = vsub.f32 %v1813_v45, %v1868_v34  ;;  %v370_v50 = vsub.f32 %v1828_v51, %v1870_v35  ;;  %v407_v19 = vmul.f32 1.442695, %v359_v53  ;;  %3390 = vst [vmem:[#allocation18_spill] sm:$0xff] %v1956_v39 }
  0x32   : > { %v1940_v38 = vpop.eup %1432  ;;  %1452 = vpow2.f32 %v397_v58  ;;  %v371_v30 = vsub.f32 %v1831_v56, %v1874_v41  ;;  %v372_v45 = vsub.f32 %v1840_v61, %v1878_v46  ;;  %v409_v31 = vmul.f32 1.442695, %v360_v57  ;;  %v1973_v56 = vld [vmem:[%s1932_s22 + $0x8] sm:$0xff]  ;;  %v1979_v61 = vld [vmem:[%s1932_s22 + $0x80] sm:$0xff]  ;;  %v1992_v57 = vld [vmem:[%s1932_s22 + $0x10] sm:$0xff] }
  0x33   : > { %v1946_v18 = vpop.eup %1434  ;;  %1454 = vpow2.f32 %v399_v62  ;;  %v373_v34 = vsub.f32 %v1849_v12, %v1880_v47  ;;  %v374_v35 = vsub.f32 %v1858_v20, %v1884_v52  ;;  %v411_v25 = vmul.f32 1.442695, %v361_v59  ;;  %3391 = vst [vmem:[#allocation19_spill] sm:$0xff] %v1973_v56  ;;  %v1976_v41 = vld [vmem:[%s1932_s22 + $0x48] sm:$0xff]  ;;  %3393 = vst [vmem:[#allocation21_spill] sm:$0xff] %v1979_v61 }
  0x34   : > { %v1958_v40 = vpop.eup %1436  ;;  %1456 = vpow2.f32 %v401_v7  ;;  %v413_v32 = vmul.f32 1.442695, %v362_v60  ;;  %3392 = vst [vmem:[#allocation20_spill] sm:$0xff] %v1976_v41  ;;  %v779_v46 = vsel %vm286_vm0, %v1953_v24, -inf  ;;  %v780_v12 = vsel %vm286_vm0, %v1956_v39, -inf  ;;  %3394 = vst [vmem:[#allocation22_spill] sm:$0xff] %v1992_v57 }
  0x35   : > { %v1964_v51 = vpop.eup %1438  ;;  %1458 = vpow2.f32 %v403_v29  ;;  %v415_v47 = vmul.f32 1.442695, %v363_v22  ;;  %v417_v52 = vmul.f32 1.442695, %v364_v63  ;;  %v419_v33 = vmul.f32 1.442695, %v365_v27 }
  0x36   : > { %v1970_v26 = vpop.eup %1440  ;;  %1460 = vpow2.f32 %v405_v14  ;;  %v421_v37 = vmul.f32 1.442695, %v366_v28  ;;  %v423_v42 = vmul.f32 1.442695, %v367_v8  ;;  %v425_v48 = vmul.f32 1.442695, %v368_v13 }
  0x37   : > { %v1985_v20 = vpop.eup %1442  ;;  %1462 = vpow2.f32 %v407_v19  ;;  %v427_v54 = vmul.f32 1.442695, %v369_v44  ;;  %v429_v55 = vmul.f32 1.442695, %v370_v50  ;;  %v781_v58 = vmax.f32 %v779_v46, %v780_v12  ;;  %v1997_v22 = vld [vmem:[%s1932_s22 + $0x50] sm:$0xff]  ;;  %v2004_v28 = vld [vmem:[%s1932_s22 + $0x88] sm:$0xff] }
  0x38   : > { %v1987_v36 = vpop.eup %1444  ;;  %1464 = vpow2.f32 %v409_v31  ;;  %v431_v60 = vmul.f32 1.442695, %v371_v30  ;;  %v433_v62 = vmul.f32 1.442695, %v372_v45  ;;  %3395 = vst [vmem:[#allocation23_spill] sm:$0xff] %v1997_v22  ;;  %v782_v63 = vsel %vm286_vm0, %v1979_v61, -inf }
  0x39   : > { %v1989_v53 = vpop.eup %1446  ;;  %1466 = vpow2.f32 %v411_v25  ;;  %v435_v27 = vmul.f32 1.442695, %v373_v34  ;;  %3396 = vst [vmem:[#allocation24_spill] sm:$0xff] %v2004_v28  ;;  %v2008_v29 = vsel %vm286_vm0, %v1973_v56, -inf  ;;  %v2012_v8 = vsel %vm286_vm0, %v1976_v41, -inf  ;;  %v2037_v25 = vld [vmem:[%s1932_s22 + $0x90] sm:$0xff] }
  0x3a   : > { %v1994_v59 = vpop.eup %1448  ;;  %1468 = vpow2.f32 %v413_v32  ;;  %v437_v14 = vmul.f32 1.442695, %v374_v35  ;;  %v439_v44 = vsel %vm286_vm0, %v1934_v23, 0.0  ;;  %v446_v50 = vsel %vm286_vm0, %v1940_v38, 0.0  ;;  %3397 = vst [vmem:[#allocation25_spill] sm:$0xff] %v2037_v25 }
  0x3b   : > { %v2001_v7 = vpop.eup %1450  ;;  %1470 = vpow2.f32 %v415_v47  ;;  %v2022_v30 = vmax.f32 %v781_v58, %v782_v63  ;;  %v2026_v45 = vsel %vm286_vm0, %v1992_v57, -inf  ;;  %v2030_v31 = vsel %vm286_vm0, %v1997_v22, -inf  ;;  %v2057_v58 = vld [vmem:[%s1932_s22 + $0x58] sm:$0xff] }
  0x3c   : > { %v2014_v13 = vpop.eup %1452  ;;  %1472 = vpow2.f32 %v417_v52  ;;  %v453_v35 = vsel %vm286_vm0, %v1946_v18, 0.0  ;;  %v2043_v46 = vsel %vm286_vm0, %v2004_v28, -inf  ;;  %v460_v47 = vsel %vm286_vm0, %v1958_v40, 0.0  ;;  %3399 = vst [vmem:[#allocation27_spill] sm:$0xff] %v2057_v58  ;;  %v2066_v28 = vld [vmem:[%s1932_s22 + $0x98] sm:$0xff] }
  0x3d   : > { %v2020_v19 = vpop.eup %1454  ;;  %1474 = vpow2.f32 %v419_v33  ;;  %v467_v52 = vsel %vm286_vm0, %v1964_v51, 0.0  ;;  %v474_v33 = vsel %vm286_vm0, %v1970_v26, 0.0  ;;  %v440_v32 = vsel %vm286_vm0, %v1989_v53, 0.0  ;;  %3400 = vst [vmem:[#allocation28_spill] sm:$0xff] %v2066_v28 }
  0x3e   : > { %v2032_v34 = vpop.eup %1456  ;;  %1476 = vpow2.f32 %v421_v37  ;;  %v2054_v37 = vld [vmem:[%s1932_s22 + $0x18] sm:$0xff]  ;;  %v447_v49 = vsel %vm286_vm0, %v1994_v59, 0.0  ;;  %v2078_v43 = vsel %vm286_vm0, %v2037_v25, -inf  ;;  %v454_v16 = vsel %vm286_vm0, %v2001_v7, 0.0 }
  0x3f   : > { %v2045_v12 = vpop.eup %1458  ;;  %1478 = vpow2.f32 %v423_v42  ;;  %3398 = vst [vmem:[#allocation26_spill] sm:$0xff] %v2054_v37  ;;  %v481_v42 = vsel %vm286_vm0, %v1985_v20, 0.0  ;;  %v2086_v61 = vsel %vm286_vm0, %v2054_v37, -inf  ;;  %v441_v10 = vadd.f32 %v440_v32, %v439_v44 }
  0x40   : > { %v2059_v63 = vpop.eup %1460  ;;  %1480 = vpow2.f32 %v425_v48  ;;  %v488_v48 = vsel %vm286_vm0, %v1987_v36, 0.0  ;;  %v461_v25 = vsel %vm286_vm0, %v2014_v13, 0.0  ;;  %v468_v6 = vsel %vm286_vm0, %v2020_v19, 0.0 }
  0x41   : > { %v2070_v22 = vpop.eup %1462  ;;  %1482 = vpow2.f32 %v427_v54  ;;  %v2090_v54 = vsel %vm286_vm0, %v2057_v58, -inf  ;;  %v448_v58 = vadd.f32 %v447_v49, %v446_v50  ;;  %v455_v32 = vadd.f32 %v454_v16, %v453_v35 }
  0x42   : > { %v2080_v17 = vpop.eup %1464  ;;  %1484 = vpow2.f32 %v429_v55  ;;  %v2098_v55 = vsel %vm286_vm0, %v2066_v28, -inf  ;;  %v442_v41 = vsel %vm286_vm0, %v2070_v22, 0.0  ;;  %v475_v28 = vsel %vm286_vm0, %v2032_v34, 0.0 }
  0x43   : > { %v2092_v11 = vpop.eup %1466  ;;  %1486 = vpow2.f32 %v431_v60  ;;  %v449_v44 = vsel %vm286_vm0, %v2080_v17, 0.0  ;;  %v462_v49 = vadd.f32 %v461_v25, %v460_v47  ;;  %v482_v50 = vsel %vm286_vm0, %v2045_v12, 0.0 }
  0x44   : > { %v2100_v9 = vpop.eup %1468  ;;  %1488 = vpow2.f32 %v433_v62  ;;  %v456_v62 = vsel %vm286_vm0, %v2092_v11, 0.0  ;;  %v443_v15 = vadd.f32 %v442_v41, %v441_v10  ;;  %v469_v35 = vadd.f32 %v468_v6, %v467_v52  ;;  %v2138_v52 = vld [vmem:[%s1932_s22 + $0x60] sm:$0xff] }
  0x45   : > { %v2106_v60 = vpop.eup %1470  ;;  %1490 = vpow2.f32 %v435_v27  ;;  %v463_v16 = vsel %vm286_vm0, %v2100_v9, 0.0  ;;  %v450_v4 = vadd.f32 %v449_v44, %v448_v58  ;;  %v476_v47 = vadd.f32 %v475_v28, %v474_v33  ;;  %3405 = vst [vmem:[#allocation33_spill] sm:$0xff] %v2138_v52 }
  0x46   : > { %3401 = vst [vmem:[#allocation29_spill] sm:$0xff] %v2106_v60  ;;  %v2112_v39 = vpop.eup %1472  ;;  %1492 = vpow2.f32 %v437_v14  ;;  %v489_v14 = vsel %vm286_vm0, %v2059_v63, 0.0  ;;  %v470_v25 = vsel %vm286_vm0, %v2106_v60, 0.0  ;;  %v457_v10 = vadd.f32 %v456_v62, %v455_v32 }
  0x47   : > { %3402 = vst [vmem:[#allocation30_spill] sm:$0xff] %v2112_v39  ;;  %v2121_v27 = vpop.eup %1474  ;;  %v477_v41 = vsel %vm286_vm0, %v2112_v39, 0.0  ;;  %v483_v6 = vadd.f32 %v482_v50, %v481_v42  ;;  %v2142_v58 = vsel %vm286_vm0, %v2119_v21, -inf  ;;  %v464_v33 = vadd.f32 %v463_v16, %v462_v49 }
  0x48   : > { %3404 = vst [vmem:[#allocation32_spill] sm:$0xff] %v2121_v27  ;;  %v2127_v5 = vpop.eup %1476  ;;  %v484_v32 = vsel %vm286_vm0, %v2121_v27, 0.0  ;;  %v490_v62 = vadd.f32 %v489_v14, %v488_v48  ;;  %v471_v1 = vadd.f32 %v470_v25, %v469_v35  ;;  %v478_v16 = vadd.f32 %v477_v41, %v476_v47  ;;  %v2161_v27 = vld [vmem:[%s1932_s22 + $0x28] sm:$0xff] }
  0x49   : > { %v2133_v2 = vpop.eup %1478  ;;  %v491_v39 = vsel %vm286_vm0, %v2127_v5, 0.0  ;;  %3407 = vst [vmem:[#allocation35_spill] sm:$0xff] %v2161_v27  ;;  %v808_v48 = vsel %vm286_vm0, %v2138_v52, -inf  ;;  %v485_v25 = vadd.f32 %v484_v32, %v483_v6  ;;  %v2181_v32 = vld [vmem:[%s1932_s22 + $0x30] sm:$0xff] }
  0x4a   : > { %v2144_v44 = vpop.eup %1480  ;;  %v444_v28 = vsel %vm286_vm0, %v2133_v2, 0.0  ;;  %3412 = vst [vmem:[#allocation40_spill] sm:$0xff] %v2181_v32 }
  0x4b   : > { %v2150_v3 = vpop.eup %1482  ;;  %v445_v42 = vadd.f32 %v444_v28, %v443_v15  ;;  %v451_v50 = vsel %vm286_vm0, %v2144_v44, 0.0 }
  0x4c   : > { %v2156_v0 = vpop.eup %1484  ;;  %v452_v60 = vadd.f32 %v451_v50, %v450_v4  ;;  %v458_v49 = vsel %vm286_vm0, %v2150_v3, 0.0  ;;  %v2170_v4 = vld [vmem:[%s1932_s22 + $0x68] sm:$0xff]  ;;  %v492_v50 = vadd.f32 %v491_v39, %v490_v62 }
  0x4d   : > { %3406 = vst [vmem:[#allocation34_spill] sm:$0xff] %v2156_v0  ;;  %v2165_v15 = vpop.eup %1486  ;;  %v459_v35 = vadd.f32 %v458_v49, %v457_v10  ;;  %v465_v14 = vsel %vm286_vm0, %v2156_v0, 0.0  ;;  %1494 = vrcp.f32 %v445_v42  ;;  %3409 = vst [vmem:[#allocation37_spill] sm:$0xff] %v2170_v4  ;;  %v2184_v42 = vld [vmem:[%s1932_s22 + $0x70] sm:$0xff]  ;;  %v815_v62 = vsel %vm286_vm0, %v2170_v4, -inf }
  0x4e   : > { %3408 = vst [vmem:[#allocation36_spill] sm:$0xff] %v2165_v15  ;;  %v2172_v28 = vpop.eup %1488  ;;  %v466_v47 = vadd.f32 %v465_v14, %v464_v33  ;;  %v472_v41 = vsel %vm286_vm0, %v2165_v15, 0.0  ;;  %1496 = vrcp.f32 %v452_v60  ;;  %3413 = vst [vmem:[#allocation41_spill] sm:$0xff] %v2184_v42  ;;  %v814_v33 = vsel %vm286_vm0, %v2161_v27, -inf  ;;  %v2217_v4 = vld [vmem:[%s1932_s22 + $0xd0] sm:$0xff]  ;;  %v2238_v15 = vld [vmem:[%s1932_s22 + $0x38] sm:$0xff] }
  0x4f   : > { %3410 = vst [vmem:[#allocation38_spill] sm:$0xff] %v2172_v28  ;;  %v2176_v52 = vpop.eup %1490  ;;  %v473_v10 = vadd.f32 %v472_v41, %v471_v1  ;;  %v479_v6 = vsel %vm286_vm0, %v2172_v28, 0.0  ;;  %1498 = vrcp.f32 %v459_v35  ;;  %v2193_v1 = vld [vmem:[%s1932_s22 + $0xa0] sm:$0xff]  ;;  %v2200_v41 = vld [vmem:[%s1932_s22 + $0xa8] sm:$0xff]  ;;  %3420 = vst [vmem:[#allocation48_spill] sm:$0xff] %v2217_v4 }
  0x50   : > { %3411 = vst [vmem:[#allocation39_spill] sm:$0xff] %v2176_v52  ;;  %v2188_v49 = vpop.eup %1492  ;;  %v480_v39 = vadd.f32 %v479_v6, %v478_v16  ;;  %v486_v60 = vsel %vm286_vm0, %v2176_v52, 0.0  ;;  %1500 = vrcp.f32 %v466_v47  ;;  %3415 = vst [vmem:[#allocation43_spill] sm:$0xff] %v2193_v1  ;;  %v2203_v16 = vld [vmem:[%s1932_s22 + $0xc0] sm:$0xff]  ;;  %v2206_v6 = vld [vmem:[%s1932_s22 + $0xc8] sm:$0xff]  ;;  %v809_v47 = vmax.f32 %v2142_v58, %v808_v48 }
  0x51   : > { %3414 = vst [vmem:[#allocation42_spill] sm:$0xff] %v2188_v49  ;;  %v487_v35 = vadd.f32 %v486_v60, %v485_v25  ;;  %v493_v14 = vsel %vm286_vm0, %v2188_v49, 0.0  ;;  %1502 = vrcp.f32 %v473_v10  ;;  %3416 = vst [vmem:[#allocation44_spill] sm:$0xff] %v2200_v41  ;;  %v821_v25 = vsel %vm286_vm0, %v2181_v32, -inf  ;;  %v2214_v60 = vld [vmem:[%s1932_s22 + $0xb0] sm:$0xff]  ;;  %v2220_v49 = vld [vmem:[%s1932_s22 + $0xd8] sm:$0xff] }
  0x52   : > { %3417 = vst [vmem:[#allocation45_spill] sm:$0xff] %v2203_v16  ;;  %3418 = vst [vmem:[#allocation46_spill] sm:$0xff] %v2206_v6  ;;  %v494_v52 = vadd.f32 %v493_v14, %v492_v50  ;;  %1504 = vrcp.f32 %v480_v39  ;;  %v822_v10 = vsel %vm286_vm0, %v2184_v42, -inf  ;;  %v3422_v58 = vmax.f32 %v2008_v29, %v2012_v8  ;;  %v2229_v14 = vld [vmem:[%s1932_s22 + $0xe0] sm:$0xff]  ;;  %v2241_v29 = vld [vmem:[%s1932_s22 + $0x78] sm:$0xff] }
  0x53   : > { %1506 = vrcp.f32 %v487_v35  ;;  %3419 = vst [vmem:[#allocation47_spill] sm:$0xff] %v2214_v60  ;;  %3421 = vst [vmem:[#allocation49_spill] sm:$0xff] %v2220_v49  ;;  %v810_v50 = vsel %vm286_vm0, %v2193_v1, -inf  ;;  %v816_v39 = vmax.f32 %v814_v33, %v815_v62  ;;  %v784_v35 = vsel %vm286_vm0, %v2203_v16, -inf  ;;  %v2244_v8 = vld [vmem:[%s1932_s22 + $0xe8] sm:$0xff] }
  0x54   : > { %v790_v48 = vmax.f32 %v3422_v58, %v2043_v46  ;;  %1508 = vrcp.f32 %v494_v52  ;;  %3423 = vst [vmem:[#allocation50_spill] sm:$0xff] %v2229_v14  ;;  %v791_v42 = vsel %vm286_vm0, %v2206_v6, -inf  ;;  %v817_v28 = vsel %vm286_vm0, %v2200_v41, -inf  ;;  %3424 = vst [vmem:[#allocation51_spill] sm:$0xff] %v2241_v29  ;;  %v3437_v27 = vld [vmem:[#allocation3_spill] sm:$0xff]  ;;  %v3444_v56 = vld [vmem:[#allocation34_spill] sm:$0xff] }
  0x55   : > { %3425 = vst [vmem:[#allocation52_spill] sm:$0xff] %v2244_v8  ;;  %v3426_v46 = vmax.f32 %v2026_v45, %v2030_v31  ;;  %v3427_v33 = vmax.f32 %v2086_v61, %v2090_v54  ;;  %v823_v58 = vmax.f32 %v821_v25, %v822_v10  ;;  %v798_v6 = vsel %vm286_vm0, %v2217_v4, -inf }
  0x56   : > { %v805_v16 = vsel %vm286_vm0, %v2220_v49, -inf  ;;  %v811_v41 = vmax.f32 %v809_v47, %v810_v50  ;;  %v824_v1 = vsel %vm286_vm0, %v2214_v60, -inf  ;;  %v2266_v45 = vmax.f32 %v2022_v30, %v784_v35 }
  0x57   : > { %v797_v52 = vmax.f32 %v3426_v46, %v2078_v43  ;;  %v804_v62 = vmax.f32 %v3427_v33, %v2098_v55  ;;  %v2260_v0 = vpop.eup %1494  ;;  %v2263_v43 = vld [vmem:[%s1932_s22 + $0xf0] sm:$0xff]  ;;  %v2268_v61 = vmax.f32 %v790_v48, %v791_v42  ;;  %v812_v31 = vsel %vm286_vm0, %v2229_v14, -inf  ;;  %v2291_v48 = vld [vmem:[%s1932_s22 + $0xb8] sm:$0xff] }
  0x58   : > { %3428 = vst [vmem:[#allocation53_spill] sm:$0xff] %v2263_v43  ;;  %v818_v54 = vmax.f32 %v816_v39, %v817_v28  ;;  %v2272_v55 = vpop.eup %1496  ;;  %v2276_v47 = vmul.f32 %v2260_v0, %v1934_v23  ;;  %v819_v25 = vsel %vm286_vm0, %v2244_v8, -inf  ;;  %v828_v10 = vsel %vm286_vm0, %v2238_v15, -inf  ;;  %3429 = vst [vmem:[#allocation54_spill] sm:$0xff] %v2291_v48 }
  0x59   : > { %v829_v30 = vsel %vm286_vm0, %v2241_v29, -inf  ;;  %v2284_v42 = vpop.eup %1498  ;;  %v2288_v28 = vmul.f32 %v2272_v55, %v1940_v38  ;;  %v2293_v23 = vmax.f32 %v797_v52, %v798_v6  ;;  %v2295_v50 = vmax.f32 %v804_v62, %v805_v16  ;;  %v2318_v6 = vld [vmem:[%s1932_s22 + $0xf8] sm:$0xff] }
  0x5a   : > { %v825_v39 = vmax.f32 %v823_v58, %v824_v1  ;;  %v2297_v35 = vpop.eup %1500  ;;  %v2301_v46 = vmul.f32 %v2284_v42, %v1946_v18  ;;  %v535_v33 = vsel %vm286_vm0, %v2276_v47, -inf  ;;  %v2305_v8 = vmax.f32 %v811_v41, %v812_v31  ;;  %3430 = vst [vmem:[#allocation55_spill] sm:$0xff] %v2318_v6 }
  0x5b   : > { %v826_v38 = vsel %vm286_vm0, %v2263_v43, -inf  ;;  %v2309_v14 = vpop.eup %1502  ;;  %v2313_v16 = vmul.f32 %v2297_v35, %v1958_v40  ;;  %v536_v1 = vsel %vm286_vm0, %v2288_v28, -inf  ;;  %v2320_v18 = vmax.f32 %v818_v54, %v819_v25 }
  0x5c   : > { %v830_v52 = vmax.f32 %v828_v10, %v829_v30  ;;  %v2322_v62 = vpop.eup %1504  ;;  %v2326_v41 = vmul.f32 %v2309_v14, %v1964_v51  ;;  %v537_v58 = vmax.f32 %v535_v33, %v536_v1  ;;  %v538_v31 = vsel %vm286_vm0, %v2301_v46, -inf }
  0x5d   : > { %v831_v40 = vsel %vm286_vm0, %v2291_v48, -inf  ;;  %v2332_v43 = vpop.eup %1506  ;;  %v2336_v54 = vmul.f32 %v2322_v62, %v1970_v26  ;;  %v540_v25 = vsel %vm286_vm0, %v2313_v16, -inf  ;;  %v2342_v51 = vmul.f32 %v2260_v0, %v1989_v53  ;;  %v3436_v48 = vld [vmem:[#allocation30_spill] sm:$0xff] }
  0x5e   : > { %v2344_v10 = vmax.f32 %v825_v39, %v826_v38  ;;  %v2346_v30 = vpop.eup %1508  ;;  %v539_v33 = vmax.f32 %v537_v58, %v538_v31  ;;  %v2350_v1 = vmul.f32 %v2272_v55, %v1994_v59  ;;  %v2354_v26 = vmul.f32 %v2284_v42, %v2001_v7 }
  0x5f   : > { %v833_v49 = vsel %vm286_vm0, %v2318_v6, -inf  ;;  %v2360_v53 = vmul.f32 %v2332_v43, %v1985_v20  ;;  %v542_v39 = vsel %vm286_vm0, %v2326_v41, -inf  ;;  %v832_v38 = vmax.f32 %v830_v52, %v831_v40 }
  0x60   : > { %v541_v59 = vmax.f32 %v539_v33, %v540_v25  ;;  %v2368_v31 = vmul.f32 %v2297_v35, %v2014_v13  ;;  %v2376_v20 = vmul.f32 %v2346_v30, %v1987_v36  ;;  %v544_v52 = vsel %vm286_vm0, %v2336_v54, -inf }
  0x61   : > { %v556_v40 = vsel %vm286_vm0, %v2342_v51, -inf  ;;  %v2386_v33 = vmul.f32 %v2309_v14, %v2020_v19  ;;  %v557_v6 = vsel %vm286_vm0, %v2350_v1, -inf  ;;  %v559_v36 = vsel %vm286_vm0, %v2354_v26, -inf }
  0x62   : > { %v543_v25 = vmax.f32 %v541_v59, %v542_v39  ;;  %v546_v7 = vsel %vm286_vm0, %v2360_v53, -inf  ;;  %v558_v58 = vmax.f32 %v556_v40, %v557_v6  ;;  %v2394_v4 = vmax.f32 %v832_v38, %v833_v49 }
  0x63   : > { %v2400_v19 = vmul.f32 %v2322_v62, %v2032_v34  ;;  %v561_v59 = vsel %vm286_vm0, %v2368_v31, -inf  ;;  %v548_v60 = vsel %vm286_vm0, %v2376_v20, -inf  ;;  %v2410_v49 = vmul.f32 %v2260_v0, %v2070_v22 }
  0x64   : > { %v545_v39 = vmax.f32 %v543_v25, %v544_v52  ;;  %v560_v6 = vmax.f32 %v558_v58, %v559_v36  ;;  %v2414_v38 = vmul.f32 %v2272_v55, %v2080_v17  ;;  %v2418_v52 = vmul.f32 %v2332_v43, %v2045_v12 }
  0x65   : > { %v563_v40 = vsel %vm286_vm0, %v2386_v33, -inf  ;;  %v2426_v22 = vmul.f32 %v2284_v42, %v2092_v11  ;;  %v2430_v17 = vmul.f32 %v2297_v35, %v2100_v9  ;;  %v2438_v36 = vmul.f32 %v2346_v30, %v2059_v63 }
  0x66   : > { %v547_v34 = vmax.f32 %v545_v39, %v546_v7  ;;  %v562_v58 = vmax.f32 %v560_v6, %v561_v59  ;;  %v2434_v7 = vmul.f32 %v2260_v0, %v2133_v2  ;;  %v565_v39 = vsel %vm286_vm0, %v2400_v19, -inf  ;;  %v3433_v59 = vld [vmem:[#allocation29_spill] sm:$0xff] }
  0x67   : > { %3431 = vst [vmem:[#allocation56_spill] sm:$0xff] %v2430_v17  ;;  %v2444_v11 = vmul.f32 %v2309_v14, %v3433_v59  ;;  %v577_v9 = vsel %vm286_vm0, %v2410_v49, -inf  ;;  %v578_v0 = vsel %vm286_vm0, %v2414_v38, -inf  ;;  %v580_v2 = vsel %vm286_vm0, %v2426_v22, -inf  ;;  %v3435_v59 = vld [vmem:[#allocation2_spill] sm:$0xff] }
  0x68   : > { %3432 = vst [vmem:[#allocation57_spill] sm:$0xff] %v2434_v7  ;;  %v549_v12 = vmax.f32 %v547_v34, %v548_v60  ;;  %v564_v6 = vmax.f32 %v562_v58, %v563_v40  ;;  %v567_v63 = vsel %vm286_vm0, %v2418_v52, -inf  ;;  %v579_v34 = vmax.f32 %v577_v9, %v578_v0 }
  0x69   : > { %3434 = vst [vmem:[#allocation29_spill] sm:$0xff] %v2444_v11  ;;  %v2456_v25 = vmul.f32 %v2272_v55, %v2144_v44  ;;  %v651_v40 = vmul.f32 %v2276_v47, %v3435_v59  ;;  %v2462_v13 = vmul.f32 %v2322_v62, %v3436_v48  ;;  %v582_v29 = vsel %vm286_vm0, %v2430_v17, -inf  ;;  %v3438_v55 = vld [vmem:[#allocation4_spill] sm:$0xff] }
  0x6a   : > { %v550_v60 = vrot.slane %v549_v12, 4  ;;  %v566_v58 = vmax.f32 %v564_v6, %v565_v39  ;;  %v652_v21 = vmul.f32 %v2288_v28, %v3437_v27  ;;  %v569_v9 = vsel %vm286_vm0, %v2438_v36, -inf  ;;  %v3439_v39 = vld [vmem:[#allocation32_spill] sm:$0xff]  ;;  %v3442_v27 = vld [vmem:[#allocation6_spill] sm:$0xff] }
  0x6b   : > { %v581_v44 = vmax.f32 %v579_v34, %v580_v2  ;;  %v653_v0 = vmul.f32 %v2301_v46, %v3438_v55  ;;  %v2474_v6 = vmul.f32 %v2332_v43, %v3439_v39  ;;  %v584_v48 = vsel %vm286_vm0, %v2444_v11, -inf  ;;  %v3443_v2 = vld [vmem:[#allocation7_spill] sm:$0xff] }
  0x6c   : > { %v551_v32 = vmax.f32 %v549_v12, %v550_v60  ;;  %v568_v59 = vmax.f32 %v566_v58, %v567_v63  ;;  %v3441_v12 = vld [vmem:[#allocation5_spill] sm:$0xff]  ;;  %v655_v17 = vmul.f32 %v2326_v41, %v3442_v27  ;;  %v656_v34 = vmul.f32 %v2336_v54, %v3443_v2 }
  0x6d   : > { %3440 = vst [vmem:[#allocation2_spill] sm:$0xff] %v2474_v6  ;;  %v654_v60 = vmul.f32 %v2313_v16, %v3441_v12  ;;  %v583_v57 = vmax.f32 %v581_v44, %v582_v29  ;;  %v586_v63 = vsel %vm286_vm0, %v2462_v13, -inf  ;;  %v2488_v58 = vmul.f32 %v2284_v42, %v2150_v3 }
  0x6e   : > { %v552_v37 = vrot.slane %v551_v32, 2  ;;  %v570_v55 = vmax.f32 %v568_v59, %v569_v9  ;;  %v2492_v11 = vmul.f32 %v2346_v30, %v2127_v5  ;;  %v2496_v29 = vmul.f32 %v2297_v35, %v3444_v56  ;;  %v3445_v59 = vld [vmem:[#allocation36_spill] sm:$0xff]  ;;  %v3447_v35 = vld [vmem:[#allocation15_spill] sm:$0xff] }
  0x6f   : > { %v585_v12 = vmax.f32 %v583_v57, %v584_v48  ;;  %v588_v9 = vsel %vm286_vm0, %v2474_v6, -inf  ;;  %v2502_v27 = vmul.f32 %v2309_v14, %v3445_v59  ;;  %v598_v3 = vsel %vm286_vm0, %v2434_v7, -inf  ;;  %v3448_v6 = vld [vmem:[#allocation38_spill] sm:$0xff] }
  0x70   : > { %v553_v39 = vmax.f32 %v551_v32, %v552_v37  ;;  %v571_v44 = vrot.slane %v570_v55, 4  ;;  %v599_v57 = vsel %vm286_vm0, %v2456_v25, -inf  ;;  %v601_v56 = vsel %vm286_vm0, %v2488_v58, -inf  ;;  %v3446_v32 = vld [vmem:[#allocation12_spill] sm:$0xff] }
  0x71   : > { %v587_v5 = vmax.f32 %v585_v12, %v586_v63  ;;  %v657_v42 = vmul.f32 %v2360_v53, %v3446_v32  ;;  %v658_v48 = vmul.f32 %v2376_v20, %v3447_v35  ;;  %v600_v14 = vmax.f32 %v598_v3, %v599_v57 }
  0x72   : > { %v554_v37 = vrot.slane %v553_v39, 1  ;;  %v572_v2 = vmax.f32 %v570_v55, %v571_v44  ;;  %v590_v7 = vsel %vm286_vm0, %v2492_v11, -inf  ;;  %v2518_v63 = vmul.f32 %v2322_v62, %v3448_v6 }
  0x73   : > { %v603_v12 = vsel %vm286_vm0, %v2496_v29, -inf  ;;  %v602_v44 = vmax.f32 %v600_v14, %v601_v56  ;;  %v605_v3 = vsel %vm286_vm0, %v2502_v27, -inf  ;;  %v3455_v14 = vld [vmem:[#allocation10_spill] sm:$0xff] }
  0x74   : > { %v555_v59 = vmax.f32 %v553_v39, %v554_v37  ;;  %v573_v55 = vrot.slane %v572_v2, 2  ;;  %v589_v39 = vmax.f32 %v587_v5, %v588_v9  ;;  %v3453_v5 = vld [vmem:[#allocation20_spill] sm:$0xff]  ;;  %v607_v35 = vsel %vm286_vm0, %v2518_v63, -inf }
  0x75   : > { %v844_v56 = vsub.f32 %v3453_v5, %v2268_v61 }
  0x76   : > { %vm619_vm1 = vcmp.eq.f32.partialorder %v2276_v47, %v555_v59  ;;  %vm620_vm2 = vcmp.eq.f32.partialorder %v2288_v28, %v555_v59  ;;  %vm621_vm3 = vcmp.eq.f32.partialorder %v2301_v46, %v555_v59  ;;  %vm622_vm4 = vcmp.eq.f32.partialorder %v2313_v16, %v555_v59 }
  0x77   : > { %v683_v62 = vsel %vm619_vm1, %v651_v40, 0.0  ;;  %v684_v6 = vsel %vm620_vm2, %v652_v21, 0.0  ;;  %v685_v37 = vsel %vm621_vm3, %v653_v0, 0.0  ;;  %v686_v57 = vsel %vm622_vm4, %v654_v60, 0.0  ;;  %v3450_v0 = vld [vmem:[#allocation8_spill] sm:$0xff] }
  0x78   : > { %715 = vst.msk [vmem:[%s2526_s25] sm:$0xff] %vm286_vm0, %v683_v62  ;;  %716 = vst.msk [vmem:[%s2526_s25 + $0x8] sm:$0xff] %vm286_vm0, %v684_v6  ;;  %vm623_vm5 = vcmp.eq.f32.partialorder %v2326_v41, %v555_v59  ;;  %vm624_vm6 = vcmp.eq.f32.partialorder %v2336_v54, %v555_v59  ;;  %vm625_vm7 = vcmp.eq.f32.partialorder %v2360_v53, %v555_v59  ;;  %v3449_v54 = vld [vmem:[#allocation18_spill] sm:$0xff]  ;;  %v3459_v62 = vld [vmem:[#allocation16_spill] sm:$0xff] }
  0x79   : > { %717 = vst.msk [vmem:[%s2526_s25 + $0x10] sm:$0xff] %vm286_vm0, %v685_v37  ;;  %718 = vst.msk [vmem:[%s2526_s25 + $0x18] sm:$0xff] %vm286_vm0, %v686_v57  ;;  %vm626_vm8 = vcmp.eq.f32.partialorder %v2376_v20, %v555_v59  ;;  %v687_v21 = vsel %vm623_vm5, %v655_v17, 0.0  ;;  %v688_v47 = vsel %vm624_vm6, %v656_v34, 0.0  ;;  %v689_v28 = vsel %vm625_vm7, %v657_v42, 0.0  ;;  %v3451_v17 = vld [vmem:[#allocation39_spill] sm:$0xff] }
  0x7a   : > { %v690_v46 = vsel %vm626_vm8, %v658_v48, 0.0  ;;  %719 = vst.msk [vmem:[%s2526_s25 + $0x20] sm:$0xff] %vm286_vm0, %v687_v21  ;;  %720 = vst.msk [vmem:[%s2526_s25 + $0x28] sm:$0xff] %vm286_vm0, %v688_v47  ;;  %v574_v16 = vmax.f32 %v572_v2, %v573_v55  ;;  %v591_v41 = vmax.f32 %v589_v39, %v590_v7  ;;  %v604_v40 = vmax.f32 %v602_v44, %v603_v12  ;;  %v3452_v34 = vld [vmem:[#allocation42_spill] sm:$0xff]  ;;  %v3454_v48 = vld [vmem:[#allocation9_spill] sm:$0xff] }
  0x7b   : > { %721 = vst.msk [vmem:[%s2526_s25 + $0x30] sm:$0xff] %vm286_vm0, %v689_v28  ;;  %722 = vst.msk [vmem:[%s2526_s25 + $0x38] sm:$0xff] %vm286_vm0, %v690_v46  ;;  %v843_v53 = vsub.f32 %v3449_v54, %v2266_v45  ;;  %v659_v20 = vmul.f32 %v2342_v51, %v3450_v0  ;;  %v2560_v60 = vmul.f32 %v2332_v43, %v3451_v17  ;;  %v3456_v59 = vld [vmem:[#allocation11_spill] sm:$0xff]  ;;  %v3458_v44 = vld [vmem:[#allocation14_spill] sm:$0xff] }
  0x7c   : > { %v2564_v9 = vmul.f32 %v2346_v30, %v3452_v34  ;;  %v575_v32 = vrot.slane %v574_v16, 1  ;;  %v592_v7 = vrot.slane %v591_v41, 4  ;;  %v606_v42 = vmax.f32 %v604_v40, %v605_v3  ;;  %v3457_v30 = vld [vmem:[#allocation13_spill] sm:$0xff] }
  0x7d   : > { %v660_v2 = vmul.f32 %v2350_v1, %v3454_v48  ;;  %v661_v43 = vmul.f32 %v2354_v26, %v3455_v14  ;;  %v662_v12 = vmul.f32 %v2368_v31, %v3456_v59  ;;  %v663_v55 = vmul.f32 %v2386_v33, %v3457_v30  ;;  %v3460_v37 = vld [vmem:[#allocation17_spill] sm:$0xff] }
  0x7e   : > { %v576_v39 = vmax.f32 %v574_v16, %v575_v32  ;;  %v664_v3 = vmul.f32 %v2400_v19, %v3458_v44  ;;  %v665_v6 = vmul.f32 %v2418_v52, %v3459_v62  ;;  %v666_v57 = vmul.f32 %v2438_v36, %v3460_v37  ;;  %v3463_v32 = vld [vmem:[#allocation33_spill] sm:$0xff]  ;;  %v3467_v62 = vld [vmem:[#allocation19_spill] sm:$0xff] }
  0x7f   : > { %v593_v21 = vmax.f32 %v591_v41, %v592_v7  ;;  %v608_v47 = vmax.f32 %v606_v42, %v607_v35  ;;  %v609_v28 = vsel %vm286_vm0, %v2560_v60, -inf  ;;  %v611_v46 = vsel %vm286_vm0, %v2564_v9, -inf  ;;  %v3464_v42 = vld [vmem:[#allocation37_spill] sm:$0xff] }
  0x80   : > { %vm627_vm9 = vcmp.eq.f32.partialorder %v2342_v51, %v576_v39  ;;  %vm628_vm10 = vcmp.eq.f32.partialorder %v2350_v1, %v576_v39  ;;  %vm629_vm11 = vcmp.eq.f32.partialorder %v2354_v26, %v576_v39  ;;  %vm630_vm12 = vcmp.eq.f32.partialorder %v2368_v31, %v576_v39  ;;  %v3465_v48 = vld [vmem:[#allocation41_spill] sm:$0xff] }
  0x81   : > { %v691_v16 = vsel %vm627_vm9, %v659_v20, 0.0  ;;  %v692_v40 = vsel %vm628_vm10, %v660_v2, 0.0  ;;  %v693_v41 = vsel %vm629_vm11, %v661_v43, 0.0  ;;  %v694_v0 = vsel %vm630_vm12, %v662_v12, 0.0  ;;  %v3462_v20 = vld [vmem:[#allocation27_spill] sm:$0xff]  ;;  %v1590_v43 = vld [vmem:[%s1706_s19 + $0x80] sm:$0xff] }
  0x82   : > { %723 = vst.msk [vmem:[%s2526_s25 + $0x40] sm:$0xff] %vm286_vm0, %v691_v16  ;;  %724 = vst.msk [vmem:[%s2526_s25 + $0x48] sm:$0xff] %vm286_vm0, %v692_v40  ;;  %vm631_vm13 = vcmp.eq.f32.partialorder %v2386_v33, %v576_v39  ;;  %vm632_vm14 = vcmp.eq.f32.partialorder %v2400_v19, %v576_v39  ;;  %vm633_vm15 = vcmp.eq.f32.partialorder %v2418_v52, %v576_v39  ;;  %v594_v33 = vrot.slane %v593_v21, 2  ;;  %v3461_v52 = vld [vmem:[#allocation23_spill] sm:$0xff]  ;;  %v1593_v16 = vld [vmem:[%s1706_s19 + $0x98] sm:$0xff] }
  0x83   : > { %725 = vst.msk [vmem:[%s2526_s25 + $0x50] sm:$0xff] %vm286_vm0, %v693_v41  ;;  %726 = vst.msk [vmem:[%s2526_s25 + $0x58] sm:$0xff] %vm286_vm0, %v694_v0  ;;  %vm634_vm1 = vcmp.eq.f32.partialorder %v2438_v36, %v576_v39  ;;  %v695_v51 = vsel %vm631_vm13, %v663_v55, 0.0  ;;  %v696_v1 = vsel %vm632_vm14, %v664_v3, 0.0  ;;  %v697_v26 = vsel %vm633_vm15, %v665_v6, 0.0  ;;  %v1591_v12 = vld [vmem:[%s1706_s19 + $0x88] sm:$0xff] }
  0x84   : > { %v698_v31 = vsel %vm634_vm1, %v666_v57, 0.0  ;;  %727 = vst.msk [vmem:[%s2526_s25 + $0x60] sm:$0xff] %vm286_vm0, %v695_v51  ;;  %728 = vst.msk [vmem:[%s2526_s25 + $0x68] sm:$0xff] %vm286_vm0, %v696_v1  ;;  %v610_v19 = vmax.f32 %v608_v47, %v609_v28  ;;  %v845_v36 = vsub.f32 %v3461_v52, %v2293_v23  ;;  %v846_v17 = vsub.f32 %v3462_v20, %v2295_v50  ;;  %v1592_v55 = vld [vmem:[%s1706_s19 + $0x90] sm:$0xff]  ;;  %v3469_v57 = vld [vmem:[#allocation22_spill] sm:$0xff] }
  0x85   : > { %729 = vst.msk [vmem:[%s2526_s25 + $0x70] sm:$0xff] %vm286_vm0, %v697_v26  ;;  %730 = vst.msk [vmem:[%s2526_s25 + $0x78] sm:$0xff] %vm286_vm0, %v698_v31  ;;  %v842_v34 = vsub.f32 %v2238_v15, %v2394_v4  ;;  %v847_v7 = vsub.f32 %v3463_v32, %v2305_v8  ;;  %v848_v35 = vsub.f32 %v3464_v42, %v2320_v18  ;;  %v3471_v40 = vld [vmem:[#allocation56_spill] sm:$0xff]  ;;  %v1594_v41 = vld [vmem:[%s1706_s19 + $0xa0] sm:$0xff] }
  0x86   : > { %v849_v2 = vsub.f32 %v3465_v48, %v2344_v10  ;;  %v595_v14 = vmax.f32 %v593_v21, %v594_v33  ;;  %v667_v59 = vmul.f32 %v1590_v43, %v2410_v49  ;;  %v668_v15 = vmul.f32 %v1591_v12, %v2414_v38  ;;  %v3472_v0 = vld [vmem:[#allocation29_spill] sm:$0xff]  ;;  %v1595_v26 = vld [vmem:[%s1706_s19 + $0xa8] sm:$0xff]  ;;  %v1596_v31 = vld [vmem:[%s1706_s19 + $0xb0] sm:$0xff] }
  0x87   : > { %v612_v30 = vmax.f32 %v610_v19, %v611_v46  ;;  %v669_v39 = vmul.f32 %v1592_v55, %v2426_v22  ;;  %v3466_v44 = vsub.f32 %v1953_v24, %v2266_v45  ;;  %v3468_v6 = vsub.f32 %v3467_v62, %v2268_v61  ;;  %v3473_v33 = vld [vmem:[#allocation2_spill] sm:$0xff]  ;;  %v1597_v43 = vld [vmem:[%s1706_s19 + $0xb8] sm:$0xff]  ;;  %v3485_v52 = vld [vmem:[#allocation24_spill] sm:$0xff] }
  0x88   : > { %v3470_v21 = vsub.f32 %v3469_v57, %v2293_v23  ;;  %v596_v28 = vrot.slane %v595_v14, 1  ;;  %v670_v46 = vmul.f32 %v1593_v16, %v3471_v40  ;;  %v671_v51 = vmul.f32 %v1594_v41, %v3472_v0  ;;  %v3476_v57 = vld [vmem:[#allocation31_spill] sm:$0xff] }
  0x89   : > { %v867_v3 = vmul.f32 1.442695, %v3466_v44  ;;  %v869_v37 = vmul.f32 1.442695, %v3468_v6  ;;  %v613_v1 = vrot.slane %v612_v30, 4  ;;  %v672_v24 = vmul.f32 %v1595_v26, %v2462_v13  ;;  %v3474_v44 = vld [vmem:[#allocation26_spill] sm:$0xff] }
  0x8a   : > { %v871_v47 = vmul.f32 1.442695, %v3470_v21  ;;  %v673_v19 = vmul.f32 %v1596_v31, %v3473_v33  ;;  %v674_v12 = vmul.f32 %v1597_v43, %v2492_v11  ;;  %v597_v55 = vmax.f32 %v595_v14, %v596_v28  ;;  %v3478_v26 = vld [vmem:[#allocation35_spill] sm:$0xff]  ;;  %v3480_v14 = vld [vmem:[#allocation40_spill] sm:$0xff] }
  0x8b   : > { %1510 = vpow2.f32 %v867_v3  ;;  %v3475_v62 = vsub.f32 %v3474_v44, %v2295_v50  ;;  %v3477_v21 = vsub.f32 %v3476_v57, %v2305_v8  ;;  %v614_v41 = vmax.f32 %v612_v30, %v613_v1  ;;  %v1602_v57 = vld [vmem:[%s1706_s19 + $0xe0] sm:$0xff] }
  0x8c   : > { %1512 = vpow2.f32 %v869_v37  ;;  %v3479_v31 = vsub.f32 %v3478_v26, %v2320_v18  ;;  %v3481_v37 = vsub.f32 %v3480_v14, %v2344_v10  ;;  %vm635_vm2 = vcmp.eq.f32.partialorder %v2410_v49, %v597_v55 }
  0x8d   : > { %v873_v6 = vmul.f32 1.442695, %v3475_v62  ;;  %v875_v16 = vmul.f32 1.442695, %v3477_v21  ;;  %1514 = vpow2.f32 %v871_v47  ;;  %vm636_vm3 = vcmp.eq.f32.partialorder %v2414_v38, %v597_v55  ;;  %v1601_v62 = vld [vmem:[%s1706_s19 + $0xd8] sm:$0xff] }
  0x8e   : > { %v877_v3 = vmul.f32 1.442695, %v3479_v31  ;;  %v879_v28 = vmul.f32 1.442695, %v3481_v37  ;;  %vm637_vm4 = vcmp.eq.f32.partialorder %v2426_v22, %v597_v55  ;;  %vm638_vm5 = vcmp.eq.f32.partialorder %v3471_v40, %v597_v55  ;;  %v1598_v40 = vld [vmem:[%s1706_s19 + $0xc0] sm:$0xff]  ;;  %v3484_v37 = vld [vmem:[#allocation21_spill] sm:$0xff] }
  0x8f   : > { %v699_v43 = vsel %vm635_vm2, %v667_v59, 0.0  ;;  %v700_v30 = vsel %vm636_vm3, %v668_v15, 0.0  ;;  %v701_v47 = vsel %vm637_vm4, %v669_v39, 0.0  ;;  %v702_v1 = vsel %vm638_vm5, %v670_v46, 0.0  ;;  %v3483_v46 = vld [vmem:[#allocation57_spill] sm:$0xff] }
  0x90   : > { %731 = vst.msk [vmem:[%s2526_s25 + $0x80] sm:$0xff] %vm286_vm0, %v699_v43  ;;  %732 = vst.msk [vmem:[%s2526_s25 + $0x88] sm:$0xff] %vm286_vm0, %v700_v30  ;;  %vm639_vm6 = vcmp.eq.f32.partialorder %v3472_v0, %v597_v55  ;;  %vm640_vm7 = vcmp.eq.f32.partialorder %v2462_v13, %v597_v55  ;;  %vm641_vm8 = vcmp.eq.f32.partialorder %v3473_v33, %v597_v55  ;;  %v615_v15 = vrot.slane %v614_v41, 2  ;;  %v3482_v13 = vld [vmem:[#allocation51_spill] sm:$0xff]  ;;  %v3486_v30 = vld [vmem:[#allocation25_spill] sm:$0xff] }
  0x91   : > { %733 = vst.msk [vmem:[%s2526_s25 + $0x90] sm:$0xff] %vm286_vm0, %v701_v47  ;;  %734 = vst.msk [vmem:[%s2526_s25 + $0x98] sm:$0xff] %vm286_vm0, %v702_v1  ;;  %vm642_vm9 = vcmp.eq.f32.partialorder %v2492_v11, %v597_v55  ;;  %v703_v49 = vsel %vm639_vm6, %v671_v51, 0.0  ;;  %v704_v38 = vsel %vm640_vm7, %v672_v24, 0.0  ;;  %v705_v22 = vsel %vm641_vm8, %v673_v19, 0.0  ;;  %v1599_v51 = vld [vmem:[%s1706_s19 + $0xc8] sm:$0xff] }
  0x92   : > { %v706_v59 = vsel %vm642_vm9, %v674_v12, 0.0  ;;  %735 = vst.msk [vmem:[%s2526_s25 + $0xa0] sm:$0xff] %vm286_vm0, %v703_v49  ;;  %736 = vst.msk [vmem:[%s2526_s25 + $0xa8] sm:$0xff] %vm286_vm0, %v704_v38  ;;  %v850_v39 = vsub.f32 %v3482_v13, %v2394_v4  ;;  %1516 = vpow2.f32 %v873_v6  ;;  %v881_v11 = vmul.f32 1.442695, %v842_v34  ;;  %v1600_v12 = vld [vmem:[%s1706_s19 + $0xd0] sm:$0xff] }
  0x93   : > { %737 = vst.msk [vmem:[%s2526_s25 + $0xb0] sm:$0xff] %vm286_vm0, %v705_v22  ;;  %738 = vst.msk [vmem:[%s2526_s25 + $0xb8] sm:$0xff] %vm286_vm0, %v706_v59  ;;  %v675_v0 = vmul.f32 %v1598_v40, %v3483_v46  ;;  %v676_v24 = vmul.f32 %v1599_v51, %v2456_v25  ;;  %1518 = vpow2.f32 %v875_v16  ;;  %v883_v33 = vmul.f32 1.442695, %v843_v53 }
  0x94   : > { %v616_v19 = vmax.f32 %v614_v41, %v615_v15  ;;  %v677_v55 = vmul.f32 %v1600_v12, %v2488_v58  ;;  %1520 = vpow2.f32 %v877_v3  ;;  %v885_v34 = vmul.f32 1.442695, %v844_v56  ;;  %v1603_v41 = vld [vmem:[%s1706_s19 + $0xe8] sm:$0xff]  ;;  %v1604_v56 = vld [vmem:[%s1706_s19 + $0xf0] sm:$0xff]  ;;  %v1605_v3 = vld [vmem:[%s1706_s19 + $0xf8] sm:$0xff] }
  0x95   : > { %v2699_v44 = vpop.eup %1510  ;;  %v678_v6 = vmul.f32 %v1601_v62, %v2496_v29  ;;  %v679_v54 = vmul.f32 %v1602_v57, %v2502_v27  ;;  %1522 = vpow2.f32 %v879_v28  ;;  %v887_v53 = vmul.f32 1.442695, %v845_v36  ;;  %v3491_v12 = vld [vmem:[#allocation54_spill] sm:$0xff] }
  0x96   : > { %v2708_v21 = vpop.eup %1512  ;;  %v617_v16 = vrot.slane %v616_v19, 1  ;;  %v680_v5 = vmul.f32 %v1603_v41, %v2518_v63  ;;  %v681_v26 = vmul.f32 %v1604_v56, %v2560_v60  ;;  %1524 = vpow2.f32 %v881_v11 }
  0x97   : > { %v2714_v31 = vpop.eup %1514  ;;  %v682_v14 = vmul.f32 %v1605_v3, %v2564_v9  ;;  %v851_v28 = vsub.f32 %v3484_v37, %v2266_v45  ;;  %v852_v36 = vsub.f32 %v3485_v52, %v2268_v61  ;;  %1526 = vpow2.f32 %v883_v33  ;;  %v3490_v33 = vld [vmem:[#allocation47_spill] sm:$0xff]  ;;  %v3496_v37 = vld [vmem:[#allocation50_spill] sm:$0xff] }
  0x98   : > { %v618_v43 = vmax.f32 %v616_v19, %v617_v16  ;;  %v853_v47 = vsub.f32 %v3486_v30, %v2293_v23  ;;  %1528 = vpow2.f32 %v885_v34  ;;  %v889_v1 = vmul.f32 1.442695, %v846_v17  ;;  %v3499_v30 = vld [vmem:[#allocation55_spill] sm:$0xff] }
  0x99   : > { %1530 = vpow2.f32 %v887_v53  ;;  %v891_v49 = vmul.f32 1.442695, %v847_v7  ;;  %v893_v38 = vmul.f32 1.442695, %v848_v35  ;;  %v895_v22 = vmul.f32 1.442695, %v849_v2 }
  0x9a   : > { %vm643_vm10 = vcmp.eq.f32.partialorder %v3483_v46, %v618_v43  ;;  %vm644_vm11 = vcmp.eq.f32.partialorder %v2456_v25, %v618_v43  ;;  %vm645_vm12 = vcmp.eq.f32.partialorder %v2488_v58, %v618_v43  ;;  %vm646_vm13 = vcmp.eq.f32.partialorder %v2496_v29, %v618_v43  ;;  %v3488_v2 = vld [vmem:[#allocation43_spill] sm:$0xff]  ;;  %v3489_v46 = vld [vmem:[#allocation44_spill] sm:$0xff]  ;;  %v3493_v53 = vld [vmem:[#allocation46_spill] sm:$0xff] }
  0x9b   : > { %v707_v20 = vsel %vm643_vm10, %v675_v0, 0.0  ;;  %v708_v17 = vsel %vm644_vm11, %v676_v24, 0.0  ;;  %v709_v32 = vsel %vm645_vm12, %v677_v55, 0.0  ;;  %v710_v7 = vsel %vm646_vm13, %v678_v6, 0.0  ;;  %v3492_v6 = vld [vmem:[#allocation45_spill] sm:$0xff] }
  0x9c   : > { %v2740_v59 = vpop.eup %1516  ;;  %739 = vst.msk [vmem:[%s2526_s25 + $0xc0] sm:$0xff] %vm286_vm0, %v707_v20  ;;  %740 = vst.msk [vmem:[%s2526_s25 + $0xc8] sm:$0xff] %vm286_vm0, %v708_v17  ;;  %vm647_vm14 = vcmp.eq.f32.partialorder %v2502_v27, %v618_v43  ;;  %vm648_vm15 = vcmp.eq.f32.partialorder %v2518_v63, %v618_v43  ;;  %vm649_vm1 = vcmp.eq.f32.partialorder %v2560_v60, %v618_v43  ;;  %v3487_v27 = vld [vmem:[#allocation28_spill] sm:$0xff]  ;;  %1532 = vpow2.f32 %v889_v1 }
  0x9d   : > { %741 = vst.msk [vmem:[%s2526_s25 + $0xd0] sm:$0xff] %vm286_vm0, %v709_v32  ;;  %742 = vst.msk [vmem:[%s2526_s25 + $0xd8] sm:$0xff] %vm286_vm0, %v710_v7  ;;  %vm650_vm2 = vcmp.eq.f32.partialorder %v2564_v9, %v618_v43  ;;  %v2754_v25 = vpop.eup %1518  ;;  %v711_v58 = vsel %vm647_vm14, %v679_v54, 0.0  ;;  %v712_v29 = vsel %vm648_vm15, %v680_v5, 0.0  ;;  %v713_v42 = vsel %vm649_vm1, %v681_v26, 0.0  ;;  %v3494_v5 = vld [vmem:[#allocation48_spill] sm:$0xff] }
  0x9e   : > { %v714_v35 = vsel %vm650_vm2, %v682_v14, 0.0  ;;  %v2756_v48 = vpop.eup %1520  ;;  %743 = vst.msk [vmem:[%s2526_s25 + $0xe0] sm:$0xff] %vm286_vm0, %v711_v58  ;;  %744 = vst.msk [vmem:[%s2526_s25 + $0xe8] sm:$0xff] %vm286_vm0, %v712_v29  ;;  %v854_v63 = vsub.f32 %v3487_v27, %v2295_v50  ;;  %v897_v60 = vmul.f32 1.442695, %v850_v39  ;;  %v855_v15 = vsub.f32 %v3488_v2, %v2305_v8  ;;  %v3495_v26 = vld [vmem:[#allocation49_spill] sm:$0xff] }
  0x9f   : > { %745 = vst.msk [vmem:[%s2526_s25 + $0xf0] sm:$0xff] %vm286_vm0, %v713_v42  ;;  %746 = vst.msk [vmem:[%s2526_s25 + $0xf8] sm:$0xff] %vm286_vm0, %v714_v35  ;;  %v2771_v9 = vpop.eup %1522  ;;  %1534 = vpow2.f32 %v891_v49  ;;  %v899_v11 = vmul.f32 1.442695, %v851_v28  ;;  %v856_v0 = vsub.f32 %v3489_v46, %v2320_v18  ;;  %v901_v51 = vmul.f32 1.442695, %v852_v36 }
  0xa0   : > { %v2775_v40 = vpop.eup %1524  ;;  %1536 = vpow2.f32 %v893_v38  ;;  %v857_v13 = vsub.f32 %v3490_v33, %v2344_v10  ;;  %v903_v39 = vmul.f32 1.442695, %v853_v47  ;;  %v858_v55 = vsub.f32 %v3491_v12, %v2394_v4 }
  0xa1   : > { %v2779_v24 = vpop.eup %1526  ;;  %1538 = vpow2.f32 %v895_v22  ;;  %v905_v34 = vmul.f32 1.442695, %v854_v63  ;;  %v859_v57 = vsub.f32 %v3492_v6, %v2266_v45  ;;  %v907_v54 = vmul.f32 1.442695, %v855_v15  ;;  %v3497_v45 = vld [vmem:[#allocation52_spill] sm:$0xff] }
  0xa2   : > { %v2783_v19 = vpop.eup %1528  ;;  %1540 = vpow2.f32 %v897_v60  ;;  %v860_v16 = vsub.f32 %v3493_v53, %v2268_v61  ;;  %v909_v41 = vmul.f32 1.442695, %v856_v0  ;;  %v861_v56 = vsub.f32 %v3494_v5, %v2293_v23  ;;  %v3498_v61 = vld [vmem:[#allocation53_spill] sm:$0xff] }
  0xa3   : > { %v2787_v62 = vpop.eup %1530  ;;  %1542 = vpow2.f32 %v899_v11  ;;  %v862_v3 = vsub.f32 %v3495_v26, %v2295_v50  ;;  %v911_v14 = vmul.f32 1.442695, %v857_v13  ;;  %v863_v28 = vsub.f32 %v3496_v37, %v2305_v8 }
  0xa4   : > { %1544 = vpow2.f32 %v901_v51  ;;  %v864_v52 = vsub.f32 %v3497_v45, %v2320_v18  ;;  %v913_v36 = vmul.f32 1.442695, %v858_v55  ;;  %v865_v43 = vsub.f32 %v3498_v61, %v2344_v10 }
  0xa5   : > { %1546 = vpow2.f32 %v903_v39  ;;  %v866_v47 = vsub.f32 %v3499_v30, %v2394_v4  ;;  %v915_v23 = vmul.f32 1.442695, %v859_v57  ;;  %v917_v50 = vmul.f32 1.442695, %v860_v16 }
  0xa6   : > { %1548 = vpow2.f32 %v905_v34  ;;  %v2805_v1 = vpop.eup %1532  ;;  %v919_v8 = vmul.f32 1.442695, %v861_v56  ;;  %v921_v18 = vmul.f32 1.442695, %v862_v3  ;;  %v923_v22 = vmul.f32 1.442695, %v863_v28 }
  0xa7   : > { %1550 = vpow2.f32 %v907_v54  ;;  %v925_v20 = vmul.f32 1.442695, %v864_v52  ;;  %v927_v4 = vmul.f32 1.442695, %v865_v43  ;;  %v929_v17 = vmul.f32 1.442695, %v866_v47 }
  0xa8   : > { %1552 = vpow2.f32 %v909_v41  ;;  %v931_v32 = vsel %vm286_vm0, %v2699_v44, 0.0  ;;  %v932_v58 = vsel %vm286_vm0, %v2779_v24, 0.0  ;;  %v938_v29 = vsel %vm286_vm0, %v2708_v21, 0.0 }
  0xa9   : > { %v2807_v49 = vpop.eup %1534  ;;  %1554 = vpow2.f32 %v911_v14  ;;  %v945_v42 = vsel %vm286_vm0, %v2714_v31, 0.0  ;;  %v939_v27 = vsel %vm286_vm0, %v2783_v19, 0.0  ;;  %v952_v63 = vsel %vm286_vm0, %v2740_v59, 0.0 }
  0xaa   : > { %v2809_v38 = vpop.eup %1536  ;;  %1556 = vpow2.f32 %v913_v36  ;;  %v959_v60 = vsel %vm286_vm0, %v2754_v25, 0.0  ;;  %v946_v15 = vsel %vm286_vm0, %v2787_v62, 0.0  ;;  %v966_v11 = vsel %vm286_vm0, %v2756_v48, 0.0 }
  0xab   : > { %v2811_v10 = vpop.eup %1538  ;;  %1558 = vpow2.f32 %v915_v23  ;;  %v973_v46 = vsel %vm286_vm0, %v2771_v9, 0.0  ;;  %v933_v51 = vadd.f32 %v932_v58, %v931_v32  ;;  %v953_v33 = vsel %vm286_vm0, %v2805_v1, 0.0 }
  0xac   : > { %v2815_v7 = vpop.eup %1540  ;;  %1560 = vpow2.f32 %v917_v50  ;;  %v980_v13 = vsel %vm286_vm0, %v2775_v40, 0.0  ;;  %v940_v55 = vadd.f32 %v939_v27, %v938_v29  ;;  %v960_v34 = vsel %vm286_vm0, %v2807_v49, 0.0 }
  0xad   : > { %v2823_v35 = vpop.eup %1542  ;;  %1562 = vpow2.f32 %v919_v8  ;;  %v947_v54 = vadd.f32 %v946_v15, %v945_v42  ;;  %v967_v53 = vsel %vm286_vm0, %v2809_v38, 0.0  ;;  %v954_v5 = vadd.f32 %v953_v33, %v952_v63 }
  0xae   : > { %v2831_v2 = vpop.eup %1544  ;;  %1564 = vpow2.f32 %v921_v18  ;;  %v934_v12 = vsel %vm286_vm0, %v2823_v35, 0.0  ;;  %v974_v56 = vsel %vm286_vm0, %v2811_v10, 0.0  ;;  %v961_v37 = vadd.f32 %v960_v34, %v959_v60 }
  0xaf   : > { %v2839_v0 = vpop.eup %1546  ;;  %1566 = vpow2.f32 %v923_v22  ;;  %v941_v57 = vsel %vm286_vm0, %v2831_v2, 0.0  ;;  %v935_v3 = vadd.f32 %v934_v12, %v933_v51  ;;  %v981_v28 = vsel %vm286_vm0, %v2815_v7, 0.0 }
  0xb0   : > { %v2845_v39 = vpop.eup %1548  ;;  %1568 = vpow2.f32 %v925_v20  ;;  %v948_v41 = vsel %vm286_vm0, %v2839_v0, 0.0  ;;  %v942_v52 = vadd.f32 %v941_v57, %v940_v55  ;;  %v968_v61 = vadd.f32 %v967_v53, %v966_v11 }
  0xb1   : > { %v2851_v6 = vpop.eup %1550  ;;  %1570 = vpow2.f32 %v927_v4  ;;  %v955_v14 = vsel %vm286_vm0, %v2845_v39, 0.0  ;;  %v949_v30 = vadd.f32 %v948_v41, %v947_v54  ;;  %v975_v23 = vadd.f32 %v974_v56, %v973_v46 }
  0xb2   : > { %v2857_v16 = vpop.eup %1552  ;;  %1572 = vpow2.f32 %v929_v17  ;;  %v962_v36 = vsel %vm286_vm0, %v2851_v6, 0.0  ;;  %v956_v18 = vadd.f32 %v955_v14, %v954_v5  ;;  %v982_v20 = vadd.f32 %v981_v28, %v980_v13 }
  0xb3   : > { %v2863_v26 = vpop.eup %1554  ;;  %v969_v47 = vsel %vm286_vm0, %v2857_v16, 0.0  ;;  %v963_v58 = vadd.f32 %v962_v36, %v961_v37 }
  0xb4   : > { %v2869_v45 = vpop.eup %1556  ;;  %v976_v22 = vsel %vm286_vm0, %v2863_v26, 0.0  ;;  %v970_v60 = vadd.f32 %v969_v47, %v968_v61 }
  0xb5   : > { %v2873_v43 = vpop.eup %1558  ;;  %v983_v29 = vsel %vm286_vm0, %v2869_v45, 0.0  ;;  %v977_v51 = vadd.f32 %v976_v22, %v975_v23 }
  0xb6   : > { %v2877_v50 = vpop.eup %1560  ;;  %v936_v8 = vsel %vm286_vm0, %v2873_v43, 0.0  ;;  %v984_v55 = vadd.f32 %v983_v29, %v982_v20 }
  0xb7   : > { %v2883_v4 = vpop.eup %1562  ;;  %v937_v17 = vadd.f32 %v936_v8, %v935_v3  ;;  %v943_v32 = vsel %vm286_vm0, %v2877_v50, 0.0 }
  0xb8   : > { %v2889_v42 = vpop.eup %1564  ;;  %v944_v27 = vadd.f32 %v943_v32, %v942_v52  ;;  %v950_v63 = vsel %vm286_vm0, %v2883_v4, 0.0 }
  0xb9   : > { %v2893_v15 = vpop.eup %1566  ;;  %v951_v11 = vadd.f32 %v950_v63, %v949_v30  ;;  %v957_v46 = vsel %vm286_vm0, %v2889_v42, 0.0  ;;  %1574 = vrcp.f32 %v937_v17 }
  0xba   : > { %v2897_v33 = vpop.eup %1568  ;;  %v958_v13 = vadd.f32 %v957_v46, %v956_v18  ;;  %v964_v12 = vsel %vm286_vm0, %v2893_v15, 0.0  ;;  %1576 = vrcp.f32 %v944_v27 }
  0xbb   : > { %v2901_v34 = vpop.eup %1570  ;;  %v965_v57 = vadd.f32 %v964_v12, %v963_v58  ;;  %v971_v54 = vsel %vm286_vm0, %v2897_v33, 0.0  ;;  %1578 = vrcp.f32 %v951_v11  ;;  %v1606_v58 = vld [vmem:[%s1932_s22 + $0x18] sm:$0xff] }
  0xbc   : > { %v2905_v53 = vpop.eup %1572  ;;  %v972_v41 = vadd.f32 %v971_v54, %v970_v60  ;;  %v978_v5 = vsel %vm286_vm0, %v2901_v34, 0.0  ;;  %1580 = vrcp.f32 %v958_v13  ;;  %v1607_v60 = vld [vmem:[%s1932_s22 + $0x20] sm:$0xff] }
  0xbd   : > { %v979_v56 = vadd.f32 %v978_v5, %v977_v51  ;;  %v985_v3 = vsel %vm286_vm0, %v2905_v53, 0.0  ;;  %1582 = vrcp.f32 %v965_v57 }
  0xbe   : > { %v986_v14 = vadd.f32 %v985_v3, %v984_v55  ;;  %1584 = vrcp.f32 %v972_v41 }
  0xbf   : > { %1586 = vrcp.f32 %v979_v56 }
  0xc0   : > { %1588 = vrcp.f32 %v986_v14 }
  0xc3   : > { %v2911_v37 = vpop.eup %1574 }
  0xc4   : > { %v2913_v28 = vpop.eup %1576  ;;  %v2917_v52 = vmul.f32 %v2911_v37, %v2699_v44 }
  0xc5   : > { %v2919_v36 = vpop.eup %1578  ;;  %v2923_v61 = vmul.f32 %v2913_v28, %v2708_v21 }
  0xc6   : > { %v2925_v30 = vpop.eup %1580  ;;  %v2929_v47 = vmul.f32 %v2919_v36, %v2714_v31  ;;  %v1027_v23 = vsel %vm286_vm0, %v2917_v52, -inf  ;;  %v2977_v46 = vmul.f32 %v2919_v36, %v2787_v62 }
  0xc7   : > { %v2933_v8 = vpop.eup %1582  ;;  %v2937_v44 = vmul.f32 %v2925_v30, %v2740_v59  ;;  %v1028_v21 = vsel %vm286_vm0, %v2923_v61, -inf  ;;  %v2987_v12 = vmul.f32 %v2925_v30, %v2805_v1 }
  0xc8   : > { %v2941_v18 = vpop.eup %1584  ;;  %v2945_v22 = vmul.f32 %v2933_v8, %v2754_v25  ;;  %v1029_v31 = vmax.f32 %v1027_v23, %v1028_v21  ;;  %v1030_v20 = vsel %vm286_vm0, %v2929_v47, -inf  ;;  %v2963_v25 = vmul.f32 %v2911_v37, %v2779_v24 }
  0xc9   : > { %v2949_v17 = vpop.eup %1586  ;;  %v2953_v32 = vmul.f32 %v2941_v18, %v2756_v48  ;;  %v1032_v59 = vsel %vm286_vm0, %v2937_v44, -inf  ;;  %v2959_v29 = vmul.f32 %v1606_v58, %v2937_v44  ;;  %v2973_v48 = vmul.f32 %v2913_v28, %v2783_v19 }
  0xca   : > { %v2965_v27 = vpop.eup %1588  ;;  %v1031_v63 = vmax.f32 %v1029_v31, %v1030_v20  ;;  %v2969_v11 = vmul.f32 %v1607_v60, %v2945_v22  ;;  %v2981_v51 = vmul.f32 %v2949_v17, %v2771_v9  ;;  %v1034_v24 = vsel %vm286_vm0, %v2945_v22, -inf }
  0xcb   : > { %v2991_v19 = vmul.f32 %v2965_v27, %v2775_v40  ;;  %v1036_v62 = vsel %vm286_vm0, %v2953_v32, -inf  ;;  %v1048_v55 = vsel %vm286_vm0, %v2963_v25, -inf  ;;  %v2999_v57 = vmul.f32 %v2933_v8, %v2807_v49 }
  0xcc   : > { %v1033_v13 = vmax.f32 %v1031_v63, %v1032_v59  ;;  %v1049_v54 = vsel %vm286_vm0, %v2973_v48, -inf  ;;  %v1051_v1 = vsel %vm286_vm0, %v2977_v46, -inf  ;;  %v1038_v40 = vsel %vm286_vm0, %v2981_v51, -inf }
  0xcd   : > { %v1050_v41 = vmax.f32 %v1048_v55, %v1049_v54  ;;  %v3009_v56 = vmul.f32 %v2941_v18, %v2809_v38  ;;  %v1053_v3 = vsel %vm286_vm0, %v2987_v12, -inf  ;;  %v1040_v49 = vsel %vm286_vm0, %v2991_v19, -inf }
  0xce   : > { %v1035_v9 = vmax.f32 %v1033_v13, %v1034_v24  ;;  %v3017_v23 = vmul.f32 %v2911_v37, %v2823_v35  ;;  %v3021_v21 = vmul.f32 %v2913_v28, %v2831_v2  ;;  %v3025_v38 = vmul.f32 %v2949_v17, %v2811_v10 }
  0xcf   : > { %v1052_v14 = vmax.f32 %v1050_v41, %v1051_v1  ;;  %v1055_v20 = vsel %vm286_vm0, %v2999_v57, -inf  ;;  %v3031_v58 = vmul.f32 %v2919_v36, %v2839_v0  ;;  %v3035_v35 = vmul.f32 %v2925_v30, %v2845_v39 }
  0xd0   : > { %v1037_v5 = vmax.f32 %v1035_v9, %v1036_v62  ;;  %v3039_v2 = vmul.f32 %v2965_v27, %v2815_v7  ;;  %v1057_v10 = vsel %vm286_vm0, %v3009_v56, -inf  ;;  %v3045_v60 = vmul.f32 %v2933_v8, %v2851_v6 }
  0xd1   : > { %v1054_v59 = vmax.f32 %v1052_v14, %v1053_v3  ;;  %v1069_v0 = vsel %vm286_vm0, %v3017_v23, -inf  ;;  %v1070_v39 = vsel %vm286_vm0, %v3021_v21, -inf  ;;  %v1072_v13 = vsel %vm286_vm0, %v3031_v58, -inf }
  0xd2   : > { %v1039_v31 = vmax.f32 %v1037_v5, %v1038_v40  ;;  %v1059_v62 = vsel %vm286_vm0, %v3025_v38, -inf  ;;  %v1071_v55 = vmax.f32 %v1069_v0, %v1070_v39  ;;  %v3057_v6 = vmul.f32 %v2941_v18, %v2857_v16 }
  0xd3   : > { %v1056_v24 = vmax.f32 %v1054_v59, %v1055_v20  ;;  %v1074_v54 = vsel %vm286_vm0, %v3035_v35, -inf  ;;  %v3063_v1 = vmul.f32 %v2911_v37, %v2873_v43  ;;  %v1061_v41 = vsel %vm286_vm0, %v3039_v2, -inf  ;;  %v1609_v20 = vld [vmem:[%s1932_s22 + $0x8] sm:$0xff] }
  0xd4   : > { %v1041_v63 = vmax.f32 %v1039_v31, %v1040_v49  ;;  %v1073_v5 = vmax.f32 %v1071_v55, %v1072_v13  ;;  %v3069_v3 = vmul.f32 %v2913_v28, %v2877_v50  ;;  %v1608_v49 = vld [vmem:[%s1932_s22] sm:$0xff]  ;;  %v3075_v31 = vmul.f32 %v2949_v17, %v2863_v26  ;;  %v1611_v28 = vld [vmem:[%s1932_s22 + $0x28] sm:$0xff] }
  0xd5   : > { %v1058_v9 = vmax.f32 %v1056_v24, %v1057_v10  ;;  %v1143_v16 = vmul.f32 %v1608_v49, %v2917_v52  ;;  %v1076_v43 = vsel %vm286_vm0, %v3045_v60, -inf  ;;  %v1144_v59 = vmul.f32 %v1609_v20, %v2923_v61  ;;  %v1613_v49 = vld [vmem:[%s1932_s22 + $0x38] sm:$0xff] }
  0xd6   : > { %v1042_v7 = vrot.slane %v1041_v63, 4  ;;  %v1075_v50 = vmax.f32 %v1073_v5, %v1074_v54  ;;  %v1148_v24 = vmul.f32 %v1611_v28, %v2953_v32  ;;  %v1078_v26 = vsel %vm286_vm0, %v3057_v6, -inf }
  0xd7   : > { %v1060_v14 = vmax.f32 %v1058_v9, %v1059_v62  ;;  %v3089_v39 = vmul.f32 %v2919_v36, %v2883_v4  ;;  %v3097_v55 = vmul.f32 %v2925_v30, %v2889_v42  ;;  %v1080_v54 = vsel %vm286_vm0, %v3075_v31, -inf  ;;  %v1612_v30 = vld [vmem:[%s1932_s22 + $0x30] sm:$0xff] }
  0xd8   : > { %v1043_v40 = vmax.f32 %v1041_v63, %v1042_v7  ;;  %v1610_v63 = vld [vmem:[%s1932_s22 + $0x10] sm:$0xff]  ;;  %v3093_v7 = vmul.f32 %v2965_v27, %v2869_v45  ;;  %v1077_v62 = vmax.f32 %v1075_v50, %v1076_v43  ;;  %v1090_v4 = vsel %vm286_vm0, %v3063_v1, -inf }
  0xd9   : > { %v1145_v10 = vmul.f32 %v1610_v63, %v2929_v47  ;;  %v1062_v0 = vmax.f32 %v1060_v14, %v1061_v41  ;;  %v3103_v41 = vmul.f32 %v2933_v8, %v2893_v15  ;;  %v1093_v42 = vsel %vm286_vm0, %v3089_v39, -inf }
  0xda   : > { %v1044_v37 = vrot.slane %v1043_v40, 2  ;;  %v1079_v45 = vmax.f32 %v1077_v62, %v1078_v26  ;;  %v1149_v5 = vmul.f32 %v1612_v30, %v2981_v51  ;;  %v1150_v14 = vmul.f32 %v1613_v49, %v2991_v19 }
  0xdb   : > { %v1063_v9 = vrot.slane %v1062_v0, 4  ;;  %v3119_v20 = vmul.f32 %v2941_v18, %v2897_v33  ;;  %v1095_v63 = vsel %vm286_vm0, %v3097_v55, -inf  ;;  %v1097_v26 = vsel %vm286_vm0, %v3103_v41, -inf }
  0xdc   : > { %v1045_v13 = vmax.f32 %v1043_v40, %v1044_v37  ;;  %v1091_v40 = vsel %vm286_vm0, %v3069_v3, -inf  ;;  %v1082_v37 = vsel %vm286_vm0, %v3093_v7, -inf  ;;  %v1081_v28 = vmax.f32 %v1079_v45, %v1080_v54  ;;  %v1615_v54 = vld [vmem:[%s1932_s22 + $0x48] sm:$0xff] }
  0xdd   : > { %v1064_v15 = vmax.f32 %v1062_v0, %v1063_v9  ;;  %v1092_v8 = vmax.f32 %v1090_v4, %v1091_v40  ;;  %v1099_v9 = vsel %vm286_vm0, %v3119_v20, -inf  ;;  %v1152_v4 = vmul.f32 %v1615_v54, %v2973_v48  ;;  %v1618_v40 = vld [vmem:[%s1932_s22 + $0x60] sm:$0xff]  ;;  %v1629_v54 = vld [vmem:[%s1932_s22 + $0xb8] sm:$0xff] }
  0xde   : > { %v1046_v36 = vrot.slane %v1045_v13, 1 }
  0xdf   : > { %v1065_v50 = vrot.slane %v1064_v15, 2  ;;  %v1094_v0 = vmax.f32 %v1092_v8, %v1093_v42  ;;  %v1619_v42 = vld [vmem:[%s1932_s22 + $0x68] sm:$0xff] }
  0xe0   : > { %v1047_v43 = vmax.f32 %v1045_v13, %v1046_v36  ;;  %v1616_v36 = vld [vmem:[%s1932_s22 + $0x50] sm:$0xff]  ;;  %v1156_v30 = vmul.f32 %v1619_v42, %v3009_v56 }
  0xe1   : > { %v1153_v45 = vmul.f32 %v1616_v36, %v2977_v46 }
  0xe2   : > { %vm1111_vm3 = vcmp.eq.f32.partialorder %v2917_v52, %v1047_v43  ;;  %vm1112_vm4 = vcmp.eq.f32.partialorder %v2923_v61, %v1047_v43  ;;  %vm1113_vm5 = vcmp.eq.f32.partialorder %v2929_v47, %v1047_v43  ;;  %vm1114_vm6 = vcmp.eq.f32.partialorder %v2937_v44, %v1047_v43 }
  0xe3   : > { %v1175_v33 = vsel %vm1111_vm3, %v1143_v16, 0.0  ;;  %v1176_v18 = vsel %vm1112_vm4, %v1144_v59, 0.0  ;;  %v1177_v13 = vsel %vm1113_vm5, %v1145_v10, 0.0  ;;  %v1178_v62 = vsel %vm1114_vm6, %v2959_v29, 0.0 }
  0xe4   : > { %1207 = vst.msk [vmem:[%s3127_s28] sm:$0xff] %vm286_vm0, %v1175_v33  ;;  %1208 = vst.msk [vmem:[%s3127_s28 + $0x8] sm:$0xff] %vm286_vm0, %v1176_v18  ;;  %vm1115_vm7 = vcmp.eq.f32.partialorder %v2945_v22, %v1047_v43  ;;  %vm1116_vm8 = vcmp.eq.f32.partialorder %v2953_v32, %v1047_v43  ;;  %vm1117_vm9 = vcmp.eq.f32.partialorder %v2981_v51, %v1047_v43  ;;  %v1614_v51 = vld [vmem:[%s1932_s22 + $0x40] sm:$0xff] }
  0xe5   : > { %1209 = vst.msk [vmem:[%s3127_s28 + $0x10] sm:$0xff] %vm286_vm0, %v1177_v13  ;;  %1210 = vst.msk [vmem:[%s3127_s28 + $0x18] sm:$0xff] %vm286_vm0, %v1178_v62  ;;  %vm1118_vm10 = vcmp.eq.f32.partialorder %v2991_v19, %v1047_v43  ;;  %v1179_v52 = vsel %vm1115_vm7, %v2969_v11, 0.0  ;;  %v1180_v61 = vsel %vm1116_vm8, %v1148_v24, 0.0  ;;  %v1181_v47 = vsel %vm1117_vm9, %v1149_v5, 0.0  ;;  %v1620_v5 = vld [vmem:[%s1932_s22 + $0x70] sm:$0xff] }
  0xe6   : > { %v1182_v44 = vsel %vm1118_vm10, %v1150_v14, 0.0  ;;  %1211 = vst.msk [vmem:[%s3127_s28 + $0x20] sm:$0xff] %vm286_vm0, %v1179_v52  ;;  %1212 = vst.msk [vmem:[%s3127_s28 + $0x28] sm:$0xff] %vm286_vm0, %v1180_v61  ;;  %v1066_v22 = vmax.f32 %v1064_v15, %v1065_v50  ;;  %v1083_v32 = vmax.f32 %v1081_v28, %v1082_v37  ;;  %v1096_v29 = vmax.f32 %v1094_v0, %v1095_v63  ;;  %v1621_v14 = vld [vmem:[%s1932_s22 + $0x78] sm:$0xff]  ;;  %v1622_v13 = vld [vmem:[%s1932_s22 + $0x80] sm:$0xff] }
  0xe7   : > { %1213 = vst.msk [vmem:[%s3127_s28 + $0x30] sm:$0xff] %vm286_vm0, %v1181_v47  ;;  %1214 = vst.msk [vmem:[%s3127_s28 + $0x38] sm:$0xff] %vm286_vm0, %v1182_v44  ;;  %v1151_v11 = vmul.f32 %v1614_v51, %v2963_v25  ;;  %v3161_v19 = vmul.f32 %v2949_v17, %v2901_v34  ;;  %v3165_v16 = vmul.f32 %v2965_v27, %v2905_v53  ;;  %v1617_v34 = vld [vmem:[%s1932_s22 + $0x58] sm:$0xff]  ;;  %v1623_v52 = vld [vmem:[%s1932_s22 + $0x88] sm:$0xff] }
  0xe8   : > { %v1067_v59 = vrot.slane %v1066_v22, 1  ;;  %v1084_v10 = vrot.slane %v1083_v32, 4  ;;  %v1098_v24 = vmax.f32 %v1096_v29, %v1097_v26  ;;  %v1154_v17 = vmul.f32 %v1617_v34, %v2987_v12  ;;  %v1624_v47 = vld [vmem:[%s1932_s22 + $0x90] sm:$0xff]  ;;  %v1626_v51 = vld [vmem:[%s1932_s22 + $0xa0] sm:$0xff] }
  0xe9   : > { %v1155_v53 = vmul.f32 %v1618_v40, %v2999_v57  ;;  %v1157_v49 = vmul.f32 %v1620_v5, %v3025_v38  ;;  %v1158_v15 = vmul.f32 %v1621_v14, %v3039_v2  ;;  %v1101_v37 = vsel %vm286_vm0, %v3161_v19, -inf }
  0xea   : > { %v1068_v27 = vmax.f32 %v1066_v22, %v1067_v59  ;;  %v1085_v8 = vmax.f32 %v1083_v32, %v1084_v10  ;;  %v1100_v43 = vmax.f32 %v1098_v24, %v1099_v9  ;;  %v1103_v63 = vsel %vm286_vm0, %v3165_v16, -inf  ;;  %v1625_v22 = vld [vmem:[%s1932_s22 + $0x98] sm:$0xff]  ;;  %v1627_v59 = vld [vmem:[%s1932_s22 + $0xa8] sm:$0xff]  ;;  %v1628_v24 = vld [vmem:[%s1932_s22 + $0xb0] sm:$0xff] }
  0xeb   : > { %v1159_v62 = vmul.f32 %v1622_v13, %v3017_v23  ;;  %v1160_v61 = vmul.f32 %v1623_v52, %v3021_v21  ;;  %v1161_v44 = vmul.f32 %v1624_v47, %v3031_v58  ;;  %v1162_v32 = vmul.f32 %v1625_v22, %v3035_v35 }
  0xec   : > { %vm1119_vm11 = vcmp.eq.f32.partialorder %v2963_v25, %v1068_v27  ;;  %vm1120_vm12 = vcmp.eq.f32.partialorder %v2973_v48, %v1068_v27  ;;  %vm1121_vm13 = vcmp.eq.f32.partialorder %v2977_v46, %v1068_v27  ;;  %vm1122_vm14 = vcmp.eq.f32.partialorder %v2987_v12, %v1068_v27 }
  0xed   : > { %v1183_v50 = vsel %vm1119_vm11, %v1151_v11, 0.0  ;;  %v1184_v28 = vsel %vm1120_vm12, %v1152_v4, 0.0  ;;  %v1185_v0 = vsel %vm1121_vm13, %v1153_v45, 0.0  ;;  %v1186_v26 = vsel %vm1122_vm14, %v1154_v17, 0.0 }
  0xee   : > { %1215 = vst.msk [vmem:[%s3127_s28 + $0x40] sm:$0xff] %vm286_vm0, %v1183_v50  ;;  %1216 = vst.msk [vmem:[%s3127_s28 + $0x48] sm:$0xff] %vm286_vm0, %v1184_v28  ;;  %vm1123_vm15 = vcmp.eq.f32.partialorder %v2999_v57, %v1068_v27  ;;  %vm1124_vm1 = vcmp.eq.f32.partialorder %v3009_v56, %v1068_v27  ;;  %vm1125_vm2 = vcmp.eq.f32.partialorder %v3025_v38, %v1068_v27  ;;  %v1086_v57 = vrot.slane %v1085_v8, 2  ;;  %v1636_v50 = vld [vmem:[%s1932_s22 + $0xf0] sm:$0xff] }
  0xef   : > { %1217 = vst.msk [vmem:[%s3127_s28 + $0x50] sm:$0xff] %vm286_vm0, %v1185_v0  ;;  %1218 = vst.msk [vmem:[%s3127_s28 + $0x58] sm:$0xff] %vm286_vm0, %v1186_v26  ;;  %vm1126_vm3 = vcmp.eq.f32.partialorder %v3039_v2, %v1068_v27  ;;  %v1187_v25 = vsel %vm1123_vm15, %v1155_v53, 0.0  ;;  %v1188_v48 = vsel %vm1124_vm1, %v1156_v30, 0.0  ;;  %v1189_v46 = vsel %vm1125_vm2, %v1157_v49, 0.0  ;;  %v1631_v27 = vld [vmem:[%s1932_s22 + $0xc8] sm:$0xff] }
  0xf0   : > { %v1190_v12 = vsel %vm1126_vm3, %v1158_v15, 0.0  ;;  %1219 = vst.msk [vmem:[%s3127_s28 + $0x60] sm:$0xff] %vm286_vm0, %v1187_v25  ;;  %1220 = vst.msk [vmem:[%s3127_s28 + $0x68] sm:$0xff] %vm286_vm0, %v1188_v48  ;;  %v1102_v56 = vmax.f32 %v1100_v43, %v1101_v37  ;;  %v1087_v38 = vmax.f32 %v1085_v8, %v1086_v57  ;;  %v1163_v11 = vmul.f32 %v1626_v51, %v3045_v60  ;;  %v1632_v30 = vld [vmem:[%s1932_s22 + $0xd0] sm:$0xff]  ;;  %v1633_v49 = vld [vmem:[%s1932_s22 + $0xd8] sm:$0xff] }
  0xf1   : > { %1221 = vst.msk [vmem:[%s3127_s28 + $0x70] sm:$0xff] %vm286_vm0, %v1189_v46  ;;  %1222 = vst.msk [vmem:[%s3127_s28 + $0x78] sm:$0xff] %vm286_vm0, %v1190_v12  ;;  %v1164_v10 = vmul.f32 %v1627_v59, %v3057_v6  ;;  %v1165_v9 = vmul.f32 %v1628_v24, %v3075_v31  ;;  %v1166_v4 = vmul.f32 %v1629_v54, %v3093_v7  ;;  %v1634_v8 = vld [vmem:[%s1932_s22 + $0xe0] sm:$0xff]  ;;  %v1635_v37 = vld [vmem:[%s1932_s22 + $0xe8] sm:$0xff] }
  0xf2   : > { %v1104_v2 = vmax.f32 %v1102_v56, %v1103_v63  ;;  %v1088_v33 = vrot.slane %v1087_v38, 1  ;;  %v1168_v42 = vmul.f32 %v1631_v27, %v3069_v3  ;;  %v1169_v5 = vmul.f32 %v1632_v30, %v3089_v39  ;;  %v1637_v0 = vld [vmem:[%s1932_s22 + $0xf8] sm:$0xff] }
  0xf3   : > { %v1170_v14 = vmul.f32 %v1633_v49, %v3097_v55  ;;  %v1171_v43 = vmul.f32 %v1634_v8, %v3103_v41  ;;  %v1172_v63 = vmul.f32 %v1635_v37, %v3119_v20  ;;  %v1173_v28 = vmul.f32 %v1636_v50, %v3161_v19 }
  0xf4   : > { %v1105_v18 = vrot.slane %v1104_v2, 4  ;;  %v1089_v29 = vmax.f32 %v1087_v38, %v1088_v33  ;;  %v1174_v26 = vmul.f32 %v1637_v0, %v3165_v16 }
  0xf6   : > { %v1106_v36 = vmax.f32 %v1104_v2, %v1105_v18  ;;  %vm1127_vm4 = vcmp.eq.f32.partialorder %v3017_v23, %v1089_v29  ;;  %vm1128_vm5 = vcmp.eq.f32.partialorder %v3021_v21, %v1089_v29  ;;  %vm1129_vm6 = vcmp.eq.f32.partialorder %v3031_v58, %v1089_v29 }
  0xf7   : > { %vm1130_vm7 = vcmp.eq.f32.partialorder %v3035_v35, %v1089_v29  ;;  %v1191_v45 = vsel %vm1127_vm4, %v1159_v62, 0.0  ;;  %v1192_v34 = vsel %vm1128_vm5, %v1160_v61, 0.0  ;;  %v1193_v17 = vsel %vm1129_vm6, %v1161_v44, 0.0 }
  0xf8   : > { %v1194_v40 = vsel %vm1130_vm7, %v1162_v32, 0.0  ;;  %1223 = vst.msk [vmem:[%s3127_s28 + $0x80] sm:$0xff] %vm286_vm0, %v1191_v45  ;;  %1224 = vst.msk [vmem:[%s3127_s28 + $0x88] sm:$0xff] %vm286_vm0, %v1192_v34  ;;  %vm1131_vm8 = vcmp.eq.f32.partialorder %v3045_v60, %v1089_v29  ;;  %vm1132_vm9 = vcmp.eq.f32.partialorder %v3057_v6, %v1089_v29  ;;  %vm1133_vm10 = vcmp.eq.f32.partialorder %v3075_v31, %v1089_v29 }
  0xf9   : > { %1225 = vst.msk [vmem:[%s3127_s28 + $0x90] sm:$0xff] %vm286_vm0, %v1193_v17  ;;  %1226 = vst.msk [vmem:[%s3127_s28 + $0x98] sm:$0xff] %vm286_vm0, %v1194_v40  ;;  %vm1134_vm11 = vcmp.eq.f32.partialorder %v3093_v7, %v1089_v29  ;;  %v1195_v23 = vsel %vm1131_vm8, %v1163_v11, 0.0  ;;  %v1196_v21 = vsel %vm1132_vm9, %v1164_v10, 0.0  ;;  %v1197_v58 = vsel %vm1133_vm10, %v1165_v9, 0.0  ;;  %v1630_v7 = vld [vmem:[%s1932_s22 + $0xc0] sm:$0xff] }
  0xfa   : > { %v1198_v35 = vsel %vm1134_vm11, %v1166_v4, 0.0  ;;  %1227 = vst.msk [vmem:[%s3127_s28 + $0xa0] sm:$0xff] %vm286_vm0, %v1195_v23  ;;  %1228 = vst.msk [vmem:[%s3127_s28 + $0xa8] sm:$0xff] %vm286_vm0, %v1196_v21  ;;  %v1107_v60 = vrot.slane %v1106_v36, 2  ;;  %v1167_v53 = vmul.f32 %v1630_v7, %v3063_v1 }
  0xfb   : > { %1229 = vst.msk [vmem:[%s3127_s28 + $0xb0] sm:$0xff] %vm286_vm0, %v1197_v58  ;;  %1230 = vst.msk [vmem:[%s3127_s28 + $0xb8] sm:$0xff] %vm286_vm0, %v1198_v35 }
  0xfc   : > { %v1108_v6 = vmax.f32 %v1106_v36, %v1107_v60 }
  0xfe   : > { %v1109_v31 = vrot.slane %v1108_v6, 1 }
 0x100   : > { %v1110_v15 = vmax.f32 %v1108_v6, %v1109_v31 }
 0x102   : > { %vm1135_vm12 = vcmp.eq.f32.partialorder %v3063_v1, %v1110_v15  ;;  %vm1136_vm13 = vcmp.eq.f32.partialorder %v3069_v3, %v1110_v15  ;;  %vm1137_vm14 = vcmp.eq.f32.partialorder %v3089_v39, %v1110_v15  ;;  %vm1138_vm15 = vcmp.eq.f32.partialorder %v3097_v55, %v1110_v15 }
 0x103   : > { %v1199_v25 = vsel %vm1135_vm12, %v1167_v53, 0.0  ;;  %v1200_v48 = vsel %vm1136_vm13, %v1168_v42, 0.0  ;;  %v1201_v46 = vsel %vm1137_vm14, %v1169_v5, 0.0  ;;  %v1202_v12 = vsel %vm1138_vm15, %v1170_v14, 0.0 }
 0x104   : > { %1231 = vst.msk [vmem:[%s3127_s28 + $0xc0] sm:$0xff] %vm286_vm0, %v1199_v25  ;;  %1232 = vst.msk [vmem:[%s3127_s28 + $0xc8] sm:$0xff] %vm286_vm0, %v1200_v48  ;;  %vm1139_vm1 = vcmp.eq.f32.partialorder %v3103_v41, %v1110_v15  ;;  %vm1140_vm2 = vcmp.eq.f32.partialorder %v3119_v20, %v1110_v15  ;;  %vm1141_vm3 = vcmp.eq.f32.partialorder %v3161_v19, %v1110_v15 }
 0x105   : > { %1233 = vst.msk [vmem:[%s3127_s28 + $0xd0] sm:$0xff] %vm286_vm0, %v1201_v46  ;;  %1234 = vst.msk [vmem:[%s3127_s28 + $0xd8] sm:$0xff] %vm286_vm0, %v1202_v12  ;;  %vm1142_vm4 = vcmp.eq.f32.partialorder %v3165_v16, %v1110_v15  ;;  %v1203_v1 = vsel %vm1139_vm1, %v1171_v43, 0.0  ;;  %v1204_v3 = vsel %vm1140_vm2, %v1172_v63, 0.0  ;;  %v1205_v39 = vsel %vm1141_vm3, %v1173_v28, 0.0 }
 0x106   : > { %v1206_v55 = vsel %vm1142_vm4, %v1174_v26, 0.0  ;;  %1235 = vst.msk [vmem:[%s3127_s28 + $0xe0] sm:$0xff] %vm286_vm0, %v1203_v1  ;;  %1236 = vst.msk [vmem:[%s3127_s28 + $0xe8] sm:$0xff] %vm286_vm0, %v1204_v3 }
 0x107   : > { %1237 = vst.msk [vmem:[%s3127_s28 + $0xf0] sm:$0xff] %vm286_vm0, %v1205_v39  ;;  %1238 = vst.msk [vmem:[%s3127_s28 + $0xf8] sm:$0xff] %vm286_vm0, %v1206_v55 }
 0x108 PF: > { %s14_s14 = sadd.s32 1, %s1660_s14   ;;  %s3500_s12 = smov %s1656_s13 }
 0x109   : > { %p11_p5 = scmp.ge.s32.totalorder %s14_s14, 4   ;;  %s3501_s13 = smov %s3503_s15 }
 0x10b   :  { %13 = sbr.rel (!%p11_p5) target bundleno = 2 (0x2), region = 73 }

</bundles_post_ra>
